<compile_context>
chip_gen: v6e
topology: v6e:2x2x1
jax: 0.10.0
libtpu: 0.0.40
codegen_flags: <defaults>
</compile_context>

<pallas_src>
import functools

import numpy as np
import jax
import jax.numpy as jnp
from jax.experimental import pallas as pl
from jax.experimental.pallas import tpu as pltpu


def _fused_basic_block_kernel(x_ref, m1s_ref, m1_ref, m2s_ref,
                              sh1_ref, sh2_ref, out_ref, pad_ref,
                              *, H, NB, compute_dtype):
    """One grid step = NB images; every intermediate stays in VMEM/registers.

    x_ref   : (NB, H, W*C)   input slab tile (channels packed in the lane dim)
    m*_ref  : (3, W*C, W*C)  block-banded conv matrices, one per kh tap
    sh*_ref : (1, W*C)       folded BN shift (per-channel, tiled over W)
    out_ref : (NB, H, W*C)
    pad_ref : VMEM scratch (NB, H+2, W*C) f32 -- per-image height halo buffer
    """
    WC = x_ref.shape[-1]
    M = NB * H

    # Zero ONLY the halo rows (row 0 and row H+1 of every image), once per
    # grid step.  The interior stores below never overwrite them.  (Done per
    # step -- not just at program_id==0 -- so the kernel stays correct when
    # the "parallel" grid is split across TensorCores, each with its own
    # scratch.)
    zrow = jnp.zeros((NB, 1, WC), jnp.float32)
    pad_ref[:, 0:1, :] = zrow
    pad_ref[:, H + 1:H + 2, :] = zrow

    x = x_ref[...].astype(jnp.float32).reshape(M, WC)   # residual + conv1 input

    def conv3x3(xin, m_ref):
        # Height halo lives in pad_ref; width zero-padding, the kw taps and
        # the BN scale are folded into the banded (WC, WC) matrices, so a 3x3
        # conv is 3 MXU matmuls with M = NB*H rows.  The centre tap (kh=1)
        # uses the in-register value directly (no VMEM round trip).
        pad_ref[:, 1:H + 1, :] = xin.reshape(NB, H, WC)
        acc = jnp.dot(xin.astype(compute_dtype), m_ref[1],
                      preferred_element_type=jnp.float32)
        for kh in (0, 2):
            lhs = pad_ref[:, kh:kh + H, :].reshape(M, WC).astype(compute_dtype)
            acc = acc + jnp.dot(lhs, m_ref[kh],
                                preferred_element_type=jnp.float32)
        return acc

    out = conv3x3(x, m1s_ref) + sh1_ref[...]     # bn1(conv1(x))  (scale folded into M; no ReLU: module quirk)
    out = conv3x3(out, m1_ref)                   # conv1 applied a second time (module quirk)
    out = conv3x3(out, m2s_ref) + sh2_ref[...]   # bn2(conv2(out))
    out = jnp.maximum(out + x, 0.0)              # + identity, ReLU
    out_ref[...] = out.reshape(NB, H, WC).astype(out_ref.dtype)


def _band_matrices(w_oihw, W):
    """OIHW 3x3 conv weight -> (3, W*Cin, W*Cout) block-banded matrices.

    M[kh][w_in*Cin + ci, w_out*Cout + co] = w[co, ci, kh, kw] with
    w_in = w_out + (kw - 1) and 0 <= w_in < W (width zero-padding is encoded
    by the missing bands).
    """
    Co, Ci, KH, KW = w_oihw.shape
    P = np.zeros((KW, W, W), dtype=np.float32)
    for kw in range(KW):
        for wo in range(W):
            wi = wo + kw - 1
            if 0 <= wi < W:
                P[kw, wi, wo] = 1.0
    M5 = jnp.einsum('kio,cdhk->hidoc', jnp.asarray(P), w_oihw)
    return M5.reshape(KH, W * Ci, W * Co)


def prepare_basic_block_params(params, W, eps=1e-5, weights_dtype=jnp.bfloat16):
    """Fold eval-mode BN into banded conv matrices.  Call ONCE per parameter
    set and reuse (do not recompute on every forward)."""
    scale1 = params["gamma1"] / jnp.sqrt(params["var1"] + eps)
    shift1 = params["beta1"] - params["mean1"] * scale1
    scale2 = params["gamma2"] / jnp.sqrt(params["var2"] + eps)
    shift2 = params["beta2"] - params["mean2"] * scale2

    w1, w2 = params["w1"], params["w2"]
    C = w1.shape[0]
    WC = W * C
    return {
        "m1s": _band_matrices(w1 * scale1[:, None, None, None], W).astype(weights_dtype),
        "m1": _band_matrices(w1, W).astype(weights_dtype),
        "m2s": _band_matrices(w2 * scale2[:, None, None, None], W).astype(weights_dtype),
        "sh1": jnp.tile(shift1, (W,)).reshape(1, WC).astype(jnp.float32),
        "sh2": jnp.tile(shift2, (W,)).reshape(1, WC).astype(jnp.float32),
    }


def _pick_batch_tile(N, H, target_rows=128):
    """Largest divisor NB of N with NB*H <= max(target_rows, H)."""
    nb = 1
    for cand in range(1, N + 1):
        if N % cand == 0 and cand * H <= max(target_rows, H):
            nb = cand
    return nb


def basic_block_forward(x_nchw, prepared, *, block_rows=128):
    """Fused Pallas implementation of BasicBlock.forward (identity shortcut)."""
    N, C, H, W = x_nchw.shape
    WC = W * C

    # Hard assumptions of this fused kernel -- fail loudly otherwise.
    assert prepared["m1"].shape == (3, WC, WC), \
        "kernel requires in_channel == out_channel (identity shortcut, stride 1)"
    assert WC % 128 == 0, f"W*C must be a multiple of 128 lanes, got {WC}"
    assert H % 8 == 0, f"H must be a multiple of 8 sublanes, got {H}"

    NB = _pick_batch_tile(N, H, block_rows)
    grid = (N // NB,)

    # NCHW -> (N, H, W*C) lane-dense slab (channels are the fastest axis).
    x_slab = jnp.transpose(x_nchw, (0, 2, 3, 1)).reshape(N, H, WC)

    kernel = functools.partial(_fused_basic_block_kernel, H=H, NB=NB,
                               compute_dtype=prepared["m1"].dtype)

    out_slab = pl.pallas_call(
        kernel,
        out_shape=jax.ShapeDtypeStruct((N, H, WC), x_nchw.dtype),
        grid_spec=pltpu.PrefetchScalarGridSpec(
            num_scalar_prefetch=0,
            grid=grid,
            in_specs=[
                pl.BlockSpec((NB, H, WC), lambda n: (n, 0, 0)),
                pl.BlockSpec((3, WC, WC), lambda n: (0, 0, 0)),
                pl.BlockSpec((3, WC, WC), lambda n: (0, 0, 0)),
                pl.BlockSpec((3, WC, WC), lambda n: (0, 0, 0)),
                pl.BlockSpec((1, WC), lambda n: (0, 0)),
                pl.BlockSpec((1, WC), lambda n: (0, 0)),
            ],
            out_specs=pl.BlockSpec((NB, H, WC), lambda n: (n, 0, 0)),
            scratch_shapes=[pltpu.VMEM((NB, H + 2, WC), jnp.float32)],
        ),
        compiler_params=pltpu.CompilerParams(
            dimension_semantics=("parallel",)),
    )(x_slab, prepared["m1s"], prepared["m1"], prepared["m2s"],
      prepared["sh1"], prepared["sh2"])

    return jnp.transpose(out_slab.reshape(N, H, W, C), (0, 3, 1, 2))


# ----------------------------- reference (plain JAX) -------------------------
def _conv_ref(x_nhwc, w_hwio):
    return jax.lax.conv_general_dilated(
        x_nhwc, w_hwio, window_strides=(1, 1), padding="SAME",
        dimension_numbers=("NHWC", "HWIO", "NHWC"))


def basic_block_ref(x_nchw, params, eps=1e-5):
    x = jnp.transpose(x_nchw, (0, 2, 3, 1))
    w1 = jnp.transpose(params["w1"], (2, 3, 1, 0))
    w2 = jnp.transpose(params["w2"], (2, 3, 1, 0))
    scale1 = params["gamma1"] / jnp.sqrt(params["var1"] + eps)
    shift1 = params["beta1"] - params["mean1"] * scale1
    scale2 = params["gamma2"] / jnp.sqrt(params["var2"] + eps)
    shift2 = params["beta2"] - params["mean2"] * scale2

    out = _conv_ref(x, w1) * scale1 + shift1
    out = _conv_ref(out, w1)
    out = _conv_ref(out, w2) * scale2 + shift2
    out = jnp.maximum(out + x, 0.0)
    return jnp.transpose(out, (0, 3, 1, 2))


if __name__ == "__main__":
    # W*C == 128 lanes; NB = 8 images per grid step -> M = 128 MXU rows, grid=(2,)
    N, C, H, W = 16, 8, 16, 16
    key = jax.random.PRNGKey(0)
    kx, kw1, kw2, kg1, kb1, km1, kv1, kg2, kb2, km2, kv2 = jax.random.split(key, 11)

    x = jax.random.normal(kx, (N, C, H, W), dtype=jnp.float32)
    params = {
        "w1": jax.random.normal(kw1, (C, C, 3, 3), dtype=jnp.float32) * 0.1,
        "w2": jax.random.normal(kw2, (C, C, 3, 3), dtype=jnp.float32) * 0.1,
        "gamma1": jax.random.uniform(kg1, (C,), minval=0.5, maxval=1.5),
        "beta1": jax.random.normal(kb1, (C,)) * 0.1,
        "mean1": jax.random.normal(km1, (C,)) * 0.1,
        "var1": jax.random.uniform(kv1, (C,), minval=0.5, maxval=1.5),
        "gamma2": jax.random.uniform(kg2, (C,), minval=0.5, maxval=1.5),
        "beta2": jax.random.normal(kb2, (C,)) * 0.1,
        "mean2": jax.random.normal(km2, (C,)) * 0.1,
        "var2": jax.random.uniform(kv2, (C,), minval=0.5, maxval=1.5),
    }

    ref = jax.block_until_ready(basic_block_ref(x, params))

    # 1) f32 weights: strict numerical check of the fused banded-matmul formulation.
    prep_f32 = prepare_basic_block_params(params, W, weights_dtype=jnp.float32)
    out_f32 = jax.block_until_ready(basic_block_forward(x, prep_f32))
    assert out_f32.shape == (N, C, H, W)
    assert jnp.allclose(out_f32, ref, rtol=1e-4, atol=1e-4), float(
        jnp.max(jnp.abs(out_f32 - ref)))

    # 2) bf16 banded weights + bf16 MXU LHS (the performance configuration);
    #    f32 accumulation keeps the result within bf16-level tolerance of the
    #    f32 reference.
    prep_bf16 = prepare_basic_block_params(params, W, weights_dtype=jnp.bfloat16)
    out_bf16 = jax.block_until_ready(basic_block_forward(x, prep_bf16))
    assert out_bf16.shape == (N, C, H, W)
    assert jnp.allclose(out_bf16, ref, rtol=5e-2, atol=5e-2), float(
        jnp.max(jnp.abs(out_bf16 - ref)))

    print("KERNEL_OK")
</pallas_src>

<mosaic_0001>
module attributes {stable_mosaic.version = 11 : i64} {
  func.func @_fused_basic_block_kernel(%arg0: i32, %arg1: memref<8x16x128xf32, #tpu.memory_space<vmem>>, %arg2: memref<3x128x128xf32, #tpu.memory_space<vmem>>, %arg3: memref<3x128x128xf32, #tpu.memory_space<vmem>>, %arg4: memref<3x128x128xf32, #tpu.memory_space<vmem>>, %arg5: memref<1x128xf32, #tpu.memory_space<vmem>>, %arg6: memref<1x128xf32, #tpu.memory_space<vmem>>, %arg7: memref<8x16x128xf32, #tpu.memory_space<vmem>>, %arg8: memref<8x18x128xf32, #tpu.memory_space<vmem>>) attributes {dimension_semantics = [#tpu.dimension_semantics<parallel>], iteration_bounds = array<i64: 2>, scalar_prefetch = 0 : i64, scratch_operands = 1 : i64, tpu.core_type = #tpu.core_type<tc>, window_params = [{transform_indices = @transform_0, window_bounds = array<i64: 8, 16, 128>}, {pipeline_mode = #tpu.pipeline_mode<synchronous>, transform_indices = @transform_1, window_bounds = array<i64: 3, 128, 128>}, {pipeline_mode = #tpu.pipeline_mode<synchronous>, transform_indices = @transform_2, window_bounds = array<i64: 3, 128, 128>}, {pipeline_mode = #tpu.pipeline_mode<synchronous>, transform_indices = @transform_3, window_bounds = array<i64: 3, 128, 128>}, {pipeline_mode = #tpu.pipeline_mode<synchronous>, transform_indices = @transform_4, window_bounds = array<i64: 1, 128>}, {pipeline_mode = #tpu.pipeline_mode<synchronous>, transform_indices = @transform_5, window_bounds = array<i64: 1, 128>}, {transform_indices = @transform_6, window_bounds = array<i64: 8, 16, 128>}]} {
    %cst = arith.constant 0.000000e+00 : f32
    %0 = vector.broadcast %cst : f32 to vector<8x1x128xf32>
    %c0 = arith.constant 0 : index
    %c0_0 = arith.constant 0 : index
    %c0_1 = arith.constant 0 : index
    %1 = vector.load %arg8[%c0, %c0_0, %c0_1] : memref<8x18x128xf32, #tpu.memory_space<vmem>>, vector<8x1x128xf32>
    tpu.vector_store %arg8[%c0, %c0_0, %c0_1], %0 {strides = array<i32>} : memref<8x18x128xf32, #tpu.memory_space<vmem>>, vector<8x1x128xf32>,
    %c0_2 = arith.constant 0 : index
    %c17 = arith.constant 17 : index
    %c0_3 = arith.constant 0 : index
    %2 = vector.load %arg8[%c0_2, %c17, %c0_3] : memref<8x18x128xf32, #tpu.memory_space<vmem>>, vector<8x1x128xf32>
    tpu.vector_store %arg8[%c0_2, %c17, %c0_3], %0 {strides = array<i32>} : memref<8x18x128xf32, #tpu.memory_space<vmem>>, vector<8x1x128xf32>,
    %c0_4 = arith.constant 0 : index
    %c0_5 = arith.constant 0 : index
    %c0_6 = arith.constant 0 : index
    %3 = vector.load %arg1[%c0_4, %c0_5, %c0_6] : memref<8x16x128xf32, #tpu.memory_space<vmem>>, vector<8x16x128xf32>
    %4 = vector.shape_cast %3 : vector<8x16x128xf32> to vector<128x128xf32>
    %5 = vector.shape_cast %4 : vector<128x128xf32> to vector<8x16x128xf32>
    %c0_7 = arith.constant 0 : index
    %c1 = arith.constant 1 : index
    %c0_8 = arith.constant 0 : index
    %6 = vector.load %arg8[%c0_7, %c1, %c0_8] : memref<8x18x128xf32, #tpu.memory_space<vmem>>, vector<8x16x128xf32>
    tpu.vector_store %arg8[%c0_7, %c1, %c0_8], %5 {strides = array<i32>} : memref<8x18x128xf32, #tpu.memory_space<vmem>>, vector<8x16x128xf32>,
    %c1_9 = arith.constant 1 : index
    %c0_10 = arith.constant 0 : index
    %c0_11 = arith.constant 0 : index
    %7 = vector.load %arg2[%c1_9, %c0_10, %c0_11] : memref<3x128x128xf32, #tpu.memory_space<vmem>>, vector<1x128x128xf32>
    %8 = vector.shape_cast %7 : vector<1x128x128xf32> to vector<128x128xf32>
    %cst_12 = arith.constant dense<0.000000e+00> : vector<128x128xf32>
    %9 = tpu.matmul %4, %8, %cst_12 {dimension_numbers = #tpu.dot_dimension_numbers<[1], [0], [0], [1], [0, 0, 1, 1], [], []>} : vector<128x128xf32>, vector<128x128xf32>, vector<128x128xf32> -> vector<128x128xf32>
    %c0_13 = arith.constant 0 : index
    %c0_14 = arith.constant 0 : index
    %c0_15 = arith.constant 0 : index
    %10 = vector.load %arg8[%c0_13, %c0_14, %c0_15] : memref<8x18x128xf32, #tpu.memory_space<vmem>>, vector<8x16x128xf32>
    %11 = vector.shape_cast %10 : vector<8x16x128xf32> to vector<128x128xf32>
    %c0_16 = arith.constant 0 : index
    %c0_17 = arith.constant 0 : index
    %c0_18 = arith.constant 0 : index
    %12 = vector.load %arg2[%c0_16, %c0_17, %c0_18] : memref<3x128x128xf32, #tpu.memory_space<vmem>>, vector<1x128x128xf32>
    %13 = vector.shape_cast %12 : vector<1x128x128xf32> to vector<128x128xf32>
    %cst_19 = arith.constant dense<0.000000e+00> : vector<128x128xf32>
    %14 = tpu.matmul %11, %13, %cst_19 {dimension_numbers = #tpu.dot_dimension_numbers<[1], [0], [0], [1], [0, 0, 1, 1], [], []>} : vector<128x128xf32>, vector<128x128xf32>, vector<128x128xf32> -> vector<128x128xf32>
    %15 = arith.addf %9, %14 : vector<128x128xf32>
    %c0_20 = arith.constant 0 : index
    %c2 = arith.constant 2 : index
    %c0_21 = arith.constant 0 : index
    %16 = vector.load %arg8[%c0_20, %c2, %c0_21] : memref<8x18x128xf32, #tpu.memory_space<vmem>>, vector<8x16x128xf32>
    %17 = vector.shape_cast %16 : vector<8x16x128xf32> to vector<128x128xf32>
    %c2_22 = arith.constant 2 : index
    %c0_23 = arith.constant 0 : index
    %c0_24 = arith.constant 0 : index
    %18 = vector.load %arg2[%c2_22, %c0_23, %c0_24] : memref<3x128x128xf32, #tpu.memory_space<vmem>>, vector<1x128x128xf32>
    %19 = vector.shape_cast %18 : vector<1x128x128xf32> to vector<128x128xf32>
    %cst_25 = arith.constant dense<0.000000e+00> : vector<128x128xf32>
    %20 = tpu.matmul %17, %19, %cst_25 {dimension_numbers = #tpu.dot_dimension_numbers<[1], [0], [0], [1], [0, 0, 1, 1], [], []>} : vector<128x128xf32>, vector<128x128xf32>, vector<128x128xf32> -> vector<128x128xf32>
    %21 = arith.addf %15, %20 : vector<128x128xf32>
    %c0_26 = arith.constant 0 : index
    %c0_27 = arith.constant 0 : index
    %22 = vector.load %arg5[%c0_26, %c0_27] : memref<1x128xf32, #tpu.memory_space<vmem>>, vector<1x128xf32>
    %23 = vector.broadcast %22 : vector<1x128xf32> to vector<128x128xf32>
    %24 = arith.addf %21, %23 : vector<128x128xf32>
    %25 = vector.shape_cast %24 : vector<128x128xf32> to vector<8x16x128xf32>
    %c0_28 = arith.constant 0 : index
    %c1_29 = arith.constant 1 : index
    %c0_30 = arith.constant 0 : index
    %26 = vector.load %arg8[%c0_28, %c1_29, %c0_30] : memref<8x18x128xf32, #tpu.memory_space<vmem>>, vector<8x16x128xf32>
    tpu.vector_store %arg8[%c0_28, %c1_29, %c0_30], %25 {strides = array<i32>} : memref<8x18x128xf32, #tpu.memory_space<vmem>>, vector<8x16x128xf32>,
    %c1_31 = arith.constant 1 : index
    %c0_32 = arith.constant 0 : index
    %c0_33 = arith.constant 0 : index
    %27 = vector.load %arg3[%c1_31, %c0_32, %c0_33] : memref<3x128x128xf32, #tpu.memory_space<vmem>>, vector<1x128x128xf32>
    %28 = vector.shape_cast %27 : vector<1x128x128xf32> to vector<128x128xf32>
    %cst_34 = arith.constant dense<0.000000e+00> : vector<128x128xf32>
    %29 = tpu.matmul %24, %28, %cst_34 {dimension_numbers = #tpu.dot_dimension_numbers<[1], [0], [0], [1], [0, 0, 1, 1], [], []>} : vector<128x128xf32>, vector<128x128xf32>, vector<128x128xf32> -> vector<128x128xf32>
    %c0_35 = arith.constant 0 : index
    %c0_36 = arith.constant 0 : index
    %c0_37 = arith.constant 0 : index
    %30 = vector.load %arg8[%c0_35, %c0_36, %c0_37] : memref<8x18x128xf32, #tpu.memory_space<vmem>>, vector<8x16x128xf32>
    %31 = vector.shape_cast %30 : vector<8x16x128xf32> to vector<128x128xf32>
    %c0_38 = arith.constant 0 : index
    %c0_39 = arith.constant 0 : index
    %c0_40 = arith.constant 0 : index
    %32 = vector.load %arg3[%c0_38, %c0_39, %c0_40] : memref<3x128x128xf32, #tpu.memory_space<vmem>>, vector<1x128x128xf32>
    %33 = vector.shape_cast %32 : vector<1x128x128xf32> to vector<128x128xf32>
    %cst_41 = arith.constant dense<0.000000e+00> : vector<128x128xf32>
    %34 = tpu.matmul %31, %33, %cst_41 {dimension_numbers = #tpu.dot_dimension_numbers<[1], [0], [0], [1], [0, 0, 1, 1], [], []>} : vector<128x128xf32>, vector<128x128xf32>, vector<128x128xf32> -> vector<128x128xf32>
    %35 = arith.addf %29, %34 : vector<128x128xf32>
    %c0_42 = arith.constant 0 : index
    %c2_43 = arith.constant 2 : index
    %c0_44 = arith.constant 0 : index
    %36 = vector.load %arg8[%c0_42, %c2_43, %c0_44] : memref<8x18x128xf32, #tpu.memory_space<vmem>>, vector<8x16x128xf32>
    %37 = vector.shape_cast %36 : vector<8x16x128xf32> to vector<128x128xf32>
    %c2_45 = arith.constant 2 : index
    %c0_46 = arith.constant 0 : index
    %c0_47 = arith.constant 0 : index
    %38 = vector.load %arg3[%c2_45, %c0_46, %c0_47] : memref<3x128x128xf32, #tpu.memory_space<vmem>>, vector<1x128x128xf32>
    %39 = vector.shape_cast %38 : vector<1x128x128xf32> to vector<128x128xf32>
    %cst_48 = arith.constant dense<0.000000e+00> : vector<128x128xf32>
    %40 = tpu.matmul %37, %39, %cst_48 {dimension_numbers = #tpu.dot_dimension_numbers<[1], [0], [0], [1], [0, 0, 1, 1], [], []>} : vector<128x128xf32>, vector<128x128xf32>, vector<128x128xf32> -> vector<128x128xf32>
    %41 = arith.addf %35, %40 : vector<128x128xf32>
    %42 = vector.shape_cast %41 : vector<128x128xf32> to vector<8x16x128xf32>
    %c0_49 = arith.constant 0 : index
    %c1_50 = arith.constant 1 : index
    %c0_51 = arith.constant 0 : index
    %43 = vector.load %arg8[%c0_49, %c1_50, %c0_51] : memref<8x18x128xf32, #tpu.memory_space<vmem>>, vector<8x16x128xf32>
    tpu.vector_store %arg8[%c0_49, %c1_50, %c0_51], %42 {strides = array<i32>} : memref<8x18x128xf32, #tpu.memory_space<vmem>>, vector<8x16x128xf32>,
    %c1_52 = arith.constant 1 : index
    %c0_53 = arith.constant 0 : index
    %c0_54 = arith.constant 0 : index
    %44 = vector.load %arg4[%c1_52, %c0_53, %c0_54] : memref<3x128x128xf32, #tpu.memory_space<vmem>>, vector<1x128x128xf32>
    %45 = vector.shape_cast %44 : vector<1x128x128xf32> to vector<128x128xf32>
    %cst_55 = arith.constant dense<0.000000e+00> : vector<128x128xf32>
    %46 = tpu.matmul %41, %45, %cst_55 {dimension_numbers = #tpu.dot_dimension_numbers<[1], [0], [0], [1], [0, 0, 1, 1], [], []>} : vector<128x128xf32>, vector<128x128xf32>, vector<128x128xf32> -> vector<128x128xf32>
    %c0_56 = arith.constant 0 : index
    %c0_57 = arith.constant 0 : index
    %c0_58 = arith.constant 0 : index
    %47 = vector.load %arg8[%c0_56, %c0_57, %c0_58] : memref<8x18x128xf32, #tpu.memory_space<vmem>>, vector<8x16x128xf32>
    %48 = vector.shape_cast %47 : vector<8x16x128xf32> to vector<128x128xf32>
    %c0_59 = arith.constant 0 : index
    %c0_60 = arith.constant 0 : index
    %c0_61 = arith.constant 0 : index
    %49 = vector.load %arg4[%c0_59, %c0_60, %c0_61] : memref<3x128x128xf32, #tpu.memory_space<vmem>>, vector<1x128x128xf32>
    %50 = vector.shape_cast %49 : vector<1x128x128xf32> to vector<128x128xf32>
    %cst_62 = arith.constant dense<0.000000e+00> : vector<128x128xf32>
    %51 = tpu.matmul %48, %50, %cst_62 {dimension_numbers = #tpu.dot_dimension_numbers<[1], [0], [0], [1], [0, 0, 1, 1], [], []>} : vector<128x128xf32>, vector<128x128xf32>, vector<128x128xf32> -> vector<128x128xf32>
    %52 = arith.addf %46, %51 : vector<128x128xf32>
    %c0_63 = arith.constant 0 : index
    %c2_64 = arith.constant 2 : index
    %c0_65 = arith.constant 0 : index
    %53 = vector.load %arg8[%c0_63, %c2_64, %c0_65] : memref<8x18x128xf32, #tpu.memory_space<vmem>>, vector<8x16x128xf32>
    %54 = vector.shape_cast %53 : vector<8x16x128xf32> to vector<128x128xf32>
    %c2_66 = arith.constant 2 : index
    %c0_67 = arith.constant 0 : index
    %c0_68 = arith.constant 0 : index
    %55 = vector.load %arg4[%c2_66, %c0_67, %c0_68] : memref<3x128x128xf32, #tpu.memory_space<vmem>>, vector<1x128x128xf32>
    %56 = vector.shape_cast %55 : vector<1x128x128xf32> to vector<128x128xf32>
    %cst_69 = arith.constant dense<0.000000e+00> : vector<128x128xf32>
    %57 = tpu.matmul %54, %56, %cst_69 {dimension_numbers = #tpu.dot_dimension_numbers<[1], [0], [0], [1], [0, 0, 1, 1], [], []>} : vector<128x128xf32>, vector<128x128xf32>, vector<128x128xf32> -> vector<128x128xf32>
    %58 = arith.addf %52, %57 : vector<128x128xf32>
    %c0_70 = arith.constant 0 : index
    %c0_71 = arith.constant 0 : index
    %59 = vector.load %arg6[%c0_70, %c0_71] : memref<1x128xf32, #tpu.memory_space<vmem>>, vector<1x128xf32>
    %60 = vector.broadcast %59 : vector<1x128xf32> to vector<128x128xf32>
    %61 = arith.addf %58, %60 : vector<128x128xf32>
    %62 = arith.addf %61, %4 : vector<128x128xf32>
    %cst_72 = arith.constant 0.000000e+00 : f32
    %63 = vector.broadcast %cst_72 : f32 to vector<128x128xf32>
    %64 = arith.maximumf %62, %63 : vector<128x128xf32>
    %65 = vector.shape_cast %64 : vector<128x128xf32> to vector<8x16x128xf32>
    %c0_73 = arith.constant 0 : index
    %c0_74 = arith.constant 0 : index
    %c0_75 = arith.constant 0 : index
    %66 = vector.load %arg7[%c0_73, %c0_74, %c0_75] : memref<8x16x128xf32, #tpu.memory_space<vmem>>, vector<8x16x128xf32>
    tpu.vector_store %arg7[%c0_73, %c0_74, %c0_75], %65 {strides = array<i32>} : memref<8x16x128xf32, #tpu.memory_space<vmem>>, vector<8x16x128xf32>,
    return
  }
  func.func @transform_0(%arg0: i32) -> (i32, i32, i32) {
    %c0_i32 = arith.constant 0 : i32
    %c0_i32_0 = arith.constant 0 : i32
    %c0_i32_1 = arith.constant 0 : i32
    return %arg0, %c0_i32, %c0_i32_0 : i32, i32, i32
  }
  func.func @transform_1(%arg0: i32) -> (i32, i32, i32) {
    %c0_i32 = arith.constant 0 : i32
    %c0_i32_0 = arith.constant 0 : i32
    %c0_i32_1 = arith.constant 0 : i32
    %c0_i32_2 = arith.constant 0 : i32
    return %c0_i32, %c0_i32_0, %c0_i32_1 : i32, i32, i32
  }
  func.func @transform_2(%arg0: i32) -> (i32, i32, i32) {
    %c0_i32 = arith.constant 0 : i32
    %c0_i32_0 = arith.constant 0 : i32
    %c0_i32_1 = arith.constant 0 : i32
    %c0_i32_2 = arith.constant 0 : i32
    return %c0_i32, %c0_i32_0, %c0_i32_1 : i32, i32, i32
  }
  func.func @transform_3(%arg0: i32) -> (i32, i32, i32) {
    %c0_i32 = arith.constant 0 : i32
    %c0_i32_0 = arith.constant 0 : i32
    %c0_i32_1 = arith.constant 0 : i32
    %c0_i32_2 = arith.constant 0 : i32
    return %c0_i32, %c0_i32_0, %c0_i32_1 : i32, i32, i32
  }
  func.func @transform_4(%arg0: i32) -> (i32, i32) {
    %c0_i32 = arith.constant 0 : i32
    %c0_i32_0 = arith.constant 0 : i32
    %c0_i32_1 = arith.constant 0 : i32
    return %c0_i32, %c0_i32_0 : i32, i32
  }
  func.func @transform_5(%arg0: i32) -> (i32, i32) {
    %c0_i32 = arith.constant 0 : i32
    %c0_i32_0 = arith.constant 0 : i32
    %c0_i32_1 = arith.constant 0 : i32
    return %c0_i32, %c0_i32_0 : i32, i32
  }
  func.func @transform_6(%arg0: i32) -> (i32, i32, i32) {
    %c0_i32 = arith.constant 0 : i32
    %c0_i32_0 = arith.constant 0 : i32
    %c0_i32_1 = arith.constant 0 : i32
    return %arg0, %c0_i32, %c0_i32_0 : i32, i32, i32
  }
}

</mosaic_0001>

<bundles_post_ra>
// kernel: tpu_custom_call.1
= control target key start
LH: loop header
LB: loop body
LE: loop exit
PB: predicated region body
PF: predicated region fallthrough
CT: control target
= control target key end

     0   :  { %11 = vsyncpa [#allocation4], 0  ;;  %s3847_s0 = inlined_call_operand.hbm [shape: f32[16,16,128], index: 0, kind: input, shape index: {}]   ;;  %s3848_s1 = inlined_call_operand.hbm [shape: f32[3,128,128], index: 1, kind: input, shape index: {}]   ;;  %s3849_s2 = inlined_call_operand.hbm [shape: f32[3,128,128], index: 2, kind: input, shape index: {}]   ;;  %s3850_s3 = inlined_call_operand.hbm [shape: f32[3,128,128], index: 3, kind: input, shape index: {}]   ;;  %s3851_s4 = inlined_call_operand.vmem [shape: f32[1,128], index: 4, kind: input, shape index: {}]   ;;  %s3852_s5 = inlined_call_operand.vmem [shape: f32[1,128], index: 5, kind: input, shape index: {}]   ;;  %s3853_s6 = inlined_call_operand.hbm [shape: f32[16,16,128], index: 6, kind: output, shape index: {}]  }
   0x1   :  { %13 = vsyncpa [#allocation4 + $0x1], 0 }
   0x2   :  { %14 = vsyncpa [#allocation7], 0 }
   0x3   :  { %15 = vsyncpa [#allocation10], 0 }
   0x4   :  { %16 = vsyncpa [#allocation5], 0 }
   0x5   :  { %18 = vsyncpa [#allocation5 + $0x1], 0  ;;  %s3366_s21 = smov 0   ;;  %s3368_s22 = smov 0  }
   0x6   :  { %s3370_s23 = smov 0   ;;  %s3372_s24 = smov 0  }
   0x7 LB: > { %s3387_s25 = sadd.s32 4294967295, %s3319_s24   ;;  %s2207_s26 = sadd.s32 4294967294, %s3319_s24   ;;  %s3319_s24 = sphi %s3372_s24, %s3880_s24   ;;  %s3315_s23 = sphi %s3370_s23, %s3879_s23   ;;  %s3311_s22 = sphi %s3368_s22, %s3878_s22   ;;  %s3307_s21 = sphi %s3366_s21, %s3877_s21  }
   0x8   : > { %p44_p0 = scmp.ne.s32.totalorder %s3311_s22, %s3307_s21  ;;  %p3854_p1 = scmp.eq.s32.totalorder %s3387_s25, 0 }
   0x9   : > { %p173_p2 = scmp.eq.s32.totalorder %s3387_s25, 1  ;;  %p179_p3 = scmp.eq.s32.totalorder %s2207_s26, 1 }
   0xa   : > { %p3396_p4 = por %p3854_p1, %p44_p0  ;;  %p2208_p5 = scmp.ge.s32.totalorder %s3319_s24, 1 }
   0xb   : > { %p3401_p6 = por %p179_p3, %p44_p0  ;;  %p186_p7 = scmp.lt.s32.totalorder %s3319_s24, 3 }
   0xc   : > { %s3860_s27 = scalar_select %p3396_p4, 1, 0 }
   0xd   : > { %s3861_s28 = scalar_select %p3401_p6, 1, 0 }
   0xe   : > { %p3406_p8 = pnand %p2208_p5, %p186_p7  ;;  %s3321_s30 = smov [#allocation6]  }
   0xf   : > { %s198_s7 = sshll.u32 %s3321_s30, 4  ;;  %s3322_s9 = smov [#allocation8]   ;;  %s199_s7 = int_to_ptr.vmem [resolvable:$true] %s198_s7 }
  0x10   : > { %s3862_s29 = scalar_select %p3406_p8, 1, 0 }
  0x11   : > { %p3075_p9 = pneg %p3406_p8  ;;  %s211_s10 = sshll.u32 %s3322_s9, 4  ;;  %s212_s10 = int_to_ptr.vmem [resolvable:$true] %s211_s10 }
  0x12   : > { %s3323_s11 = smov [#allocation9]   ;;  %s3152_s13 = scalar_lea.vmem %s199_s7, 6144 }
  0x13   : > { %p3415_p11 = pnand %p3075_p9, %p3854_p1  ;;  %s224_s12 = sshll.u32 %s3323_s11, 4  ;;  %s225_s12 = int_to_ptr.vmem [resolvable:$true] %s224_s12 }
  0x14   : > { %p3153_p13 = scmp.ne.s32.totalorder %s199_s7, %s3152_s13  ;;  %p3160_p5 = scmp.lt.s32.totalorder %s199_s7, %s199_s7 }
  0x15   : > { %p3143_p12 = pneg %p3415_p11  ;;  %p3161_p7 = scmp.lt.s32.totalorder %s3152_s13, %s3152_s13 }
  0x17   : > { %p3155_p0 = pnand %p3153_p13, %p3143_p12  ;;  %p3162_p9 = por %p3161_p7, %p3160_p5 }
  0x19   : > { %p3156_p3 = pneg %p3155_p0 }
  0x1b   : > { %p3163_p10 = pnand %p3162_p9, %p3156_p3 }
  0x1d   : > { %3166 = shalt.err (!%p3163_p10)
}
  0x1e   : > { %s3855_s14 = smov 128   ;;  %s3856_s15 = smov 8  }
  0x1f   : > { %3078 = dma.hbm_to_vmem [thread:$0]  (!%p3415_p11), %s3848_s1, 6144, %s199_s7, [#allocation7], %s3855_s14, %s3855_s14, %s3856_s15  }
  0x20   : > { %s3178_s18 = scalar_lea.vmem %s212_s10, 6144  ;;  %p3186_p3 = scmp.lt.s32.totalorder %s212_s10, %s212_s10 }
  0x21   : > { %p3179_p13 = scmp.ne.s32.totalorder %s212_s10, %s3178_s18  ;;  %p3187_p10 = scmp.lt.s32.totalorder %s3178_s18, %s3178_s18 }
  0x23   : > { %p3181_p0 = pnand %p3179_p13, %p3143_p12  ;;  %p3188_p7 = por %p3187_p10, %p3186_p3 }
  0x25   : > { %p3182_p5 = pneg %p3181_p0 }
  0x27   : > { %p3189_p9 = pnand %p3188_p7, %p3182_p5 }
  0x29   : > { %3192 = shalt.err (!%p3189_p9)
}
  0x2a   : > { %3081 = dma.hbm_to_vmem [thread:$0]  (!%p3415_p11), %s3849_s2, 6144, %s212_s10, [#allocation7], %s3855_s14, %s3855_s14, %s3856_s15  }
  0x2b   : > { %s3204_s26 = scalar_lea.vmem %s225_s12, 6144  ;;  %p3212_p3 = scmp.lt.s32.totalorder %s225_s12, %s225_s12 }
  0x2c   : > { %p3205_p1 = scmp.ne.s32.totalorder %s225_s12, %s3204_s26  ;;  %p3213_p5 = scmp.lt.s32.totalorder %s3204_s26, %s3204_s26 }
  0x2e   : > { %p3207_p13 = pnand %p3205_p1, %p3143_p12  ;;  %p3214_p10 = por %p3213_p5, %p3212_p3 }
  0x30   : > { %p3208_p0 = pneg %p3207_p13 }
  0x32   : > { %p3215_p7 = pnand %p3214_p10, %p3208_p0 }
  0x34   : > { %3218 = shalt.err (!%p3215_p7)
}
  0x35   : > { %3084 = dma.hbm_to_vmem [thread:$0]  (!%p3415_p11), %s3850_s3, 6144, %s225_s12, [#allocation10], %s3855_s14, %s3855_s14, %s3856_s15  }
  0x36   : > { %s3455_s9 = sadd.s32 1, %s3319_s24   ;;  %s31_s10 = sadd.s32 1, %s3315_s23 }
  0x37   : > { %s28_s8 = ssub.s32 %s3319_s24, %s3455_s9  ;;  %p38_p12 = scmp.ne.s32.totalorder %s3315_s23, %s3311_s22 }
  0x38   : > { %p29_p1 = scmp.eq.s32.totalorder %s28_s8, 0  ;;  %p39_p9 = scmp.eq.s32.totalorder %s3319_s24, 0 }
  0x39   : > { %p3096_p13 = scmp.lt.s32.totalorder %s3319_s24, 2  ;;  %p3469_p3 = por %p173_p2, %p38_p12 }
  0x3a   : > { %s3465_s11 = scalar_select %p29_p1, %s3315_s23, %s31_s10  }
  0x3b   : > { %p40_p0 = por %p39_p9, %p38_p12  ;;  %s244_s16 = sand.u32 1, %s3315_s23  }
  0x3c   : > { %s3864_s13 = scalar_select %p3469_p3, 1, 0 }
  0x3d   : > { %s2232_s17 = sshll.u32 %s3319_s24, 11  ;;  %s2213_s12 = sshll.u32 %s244_s16, 7 }
  0x3e   : > { %s3478_s20 = scalar_lea.hbm %s3847_s0, %s2232_s17  ;;  %s248_s26 = scalar_lea.vmem [#allocation3], %s2213_s12 }
  0x3f   : > { %s256_s30 = sshll.u32 %s248_s26, 4  ;;  %p3480_p11 = pnand %p3096_p13, %p40_p0  ;;  %s3484_s30 = int_to_ptr.vmem [resolvable:$true] %s256_s30 }
  0x40   : > { %s3486_s8 = scalar_lea.sflag [#allocation4], %s244_s16  ;;  %s3219_s10 = scalar_lea.hbm %s3478_s20, 2048 }
  0x41   : > { %p3220_p2 = scmp.ne.s32.totalorder %s3478_s20, %s3219_s10  ;;  %p3221_p5 = pneg %p3480_p11 }
  0x42   : > { %s3224_s12 = scalar_lea.hbm %s3847_s0, 4096  ;;  %p3225_p1 = scmp.lt.s32.totalorder %s3478_s20, %s3847_s0 }
  0x43   : > { %p3222_p10 = pnand %p3221_p5, %p3220_p2  ;;  %p3226_p12 = scmp.lt.s32.totalorder %s3224_s12, %s3219_s10 }
  0x45   : > { %p3223_p7 = pneg %p3222_p10  ;;  %p3227_p9 = por %p3226_p12, %p3225_p1 }
  0x47   : > { %p3228_p13 = pnand %p3227_p9, %p3223_p7 }
  0x49   : > { %3231 = shalt.err (!%p3228_p13)
}
  0x4a   : > { %s3232_s16 = scalar_lea.vmem %s3484_s30, 2048  ;;  %s3326_s14 = smov [#allocation3]  }
  0x4b   : > { %p3233_p0 = scmp.ne.s32.totalorder %s3484_s30, %s3232_s16  ;;  %s3237_s15 = sshll.u32 %s3326_s14, 4  ;;  %s3238_s15 = int_to_ptr.vmem [resolvable:$false] %s3237_s15 }
  0x4c   : > { %s3239_s17 = scalar_lea.vmem %s3238_s15, 4096  ;;  %p3240_p10 = scmp.lt.s32.totalorder %s3484_s30, %s3238_s15 }
  0x4d   : > { %p3235_p6 = pnand %p3233_p0, %p3221_p5  ;;  %p3241_p3 = scmp.lt.s32.totalorder %s3239_s17, %s3232_s16 }
  0x4f   : > { %p3236_p2 = pneg %p3235_p6  ;;  %p3242_p4 = por %p3241_p3, %p3240_p10 }
  0x51   : > { %p3243_p8 = pnand %p3242_p4, %p3236_p2 }
  0x53   : > { %3246 = shalt.err (!%p3243_p8)
}
  0x54   : > { %s3866_s10 = smov 8   ;;  %s3867_s18 = smov 128  }
  0x55   : > { %3088 = dma.hbm_to_vmem [thread:$0]  (!%p3480_p11), %s3478_s20, 2048, %s3484_s30, %s3486_s8, %s3867_s18, %s3867_s18, %s3866_s10  }
  0x56   : > { %p3868_p6 = scmp.ne.s32.totalorder %s3862_s29, 0 }
  0x57   : > { %s3513_s14 = sand.u32 (!%p3868_p6), 1, %s3311_s22   ;;  %p3869_p4 = scmp.ne.s32.totalorder (!%p3868_p6), %s3860_s27, 0 }
  0x58   : > { %268 = sbr.rel (%p3868_p6) target bundleno = 891 (0x37b), region = 44  ;;  %s2218_s15 = sshll.u32 (!%p3868_p6), %s3513_s14, 7 }
  0x59   : > { %s271_s12 = scalar_lea.sflag (!%p3868_p6), [#allocation4], %s3513_s14  ;;  %s3519_s7 = scalar_lea.vmem (!%p3868_p6), [#allocation3], %s2218_s15 }
  0x5d   : > { %3290 = dma.done.wait (%p3869_p4), %s271_s12, 2048  }
  0x5e   : > { %3292 = vsyncadd (%p3869_p4), %s271_s12, 4294965248  ;;  %p3870_p8 = scmp.eq.s32.totalorder %s3387_s25, 0 }
  0x60   : > { %3294 = dma.done.wait (%p3870_p8), [#allocation7], 12288   ;;  %p3871_p3 = pmov %p3870_p8 }
  0x62   : > { %3296 = vsyncadd (%p3871_p3), [#allocation7], 4294955008  ;;  %p3872_p11 = pmov %p3871_p3 }
  0x63   : > { %p3873_p5 = pmov %p3871_p3 }
  0x64   : > { %3298 = dma.done.wait (%p3872_p11), [#allocation10], 6144  }
  0x65   : > { %3300 = vsyncadd (%p3873_p5), [#allocation10], 4294961152  ;;  %v3327_v0 = vmov 0.0   ;;  %v413_v1 = vld [vmem:[#allocation6 + $0x78] sm:$0xff]  ;;  %v412_v3 = vld [vmem:[#allocation6 + $0x70] sm:$0xff]  ;;  %s3747_s8 = scalar_lea.vmem [#allocation11], %s2218_s15 }
  0x66   : > { %317 = vst [vmem:[#allocation2] sm:$0x1] %v3327_v0  ;;  %318 = vst [vmem:[#allocation2 + $0x18] sm:$0x1] %v3327_v0  ;;  %v381_v2 = vld [vmem:[#allocation6 + $0xf8] sm:$0xff]  ;;  %2523 = vmatprep.subr.mxu0 %v413_v1  ;;  %v380_v4 = vld [vmem:[#allocation6 + $0xf0] sm:$0xff] }
  0x67   : > { %319 = vst [vmem:[#allocation2 + $0x30] sm:$0x1] %v3327_v0  ;;  %320 = vst [vmem:[#allocation2 + $0x48] sm:$0x1] %v3327_v0  ;;  %2579 = vmatprep.subr.mxu1 %v381_v2  ;;  %2524 = vmatpush3.msra.mxu0 %v413_v1  ;;  %v411_v5 = vld [vmem:[#allocation6 + $0x68] sm:$0xff]  ;;  %v410_v7 = vld [vmem:[#allocation6 + $0x60] sm:$0xff] }
  0x68   : > { %321 = vst [vmem:[#allocation2 + $0x60] sm:$0x1] %v3327_v0  ;;  %322 = vst [vmem:[#allocation2 + $0x78] sm:$0x1] %v3327_v0  ;;  %2580 = vmatpush3.msra.mxu1 %v381_v2  ;;  %v379_v6 = vld [vmem:[#allocation6 + $0xe8] sm:$0xff]  ;;  %2525 = vmatprep.subr.mxu0 %v412_v3  ;;  %v378_v8 = vld [vmem:[#allocation6 + $0xe0] sm:$0xff] }
  0x69   : > { %323 = vst [vmem:[#allocation2 + $0x90] sm:$0x1] %v3327_v0  ;;  %324 = vst [vmem:[#allocation2 + $0xa8] sm:$0x1] %v3327_v0  ;;  %2581 = vmatprep.subr.mxu1 %v380_v4  ;;  %2526 = vmatpush3.msra.mxu0 %v412_v3  ;;  %v409_v9 = vld [vmem:[#allocation6 + $0x58] sm:$0xff]  ;;  %v408_v11 = vld [vmem:[#allocation6 + $0x50] sm:$0xff] }
  0x6a   : > { %325 = vst [vmem:[#allocation2 + $0x11] sm:$0x1] %v3327_v0  ;;  %326 = vst [vmem:[#allocation2 + $0x29] sm:$0x1] %v3327_v0  ;;  %2582 = vmatpush3.msra.mxu1 %v380_v4  ;;  %2527 = vmatprep.subr.mxu0 %v411_v5  ;;  %v377_v10 = vld [vmem:[#allocation6 + $0xd8] sm:$0xff]  ;;  %v376_v12 = vld [vmem:[#allocation6 + $0xd0] sm:$0xff] }
  0x6b   : > { %327 = vst [vmem:[#allocation2 + $0x41] sm:$0x1] %v3327_v0  ;;  %328 = vst [vmem:[#allocation2 + $0x59] sm:$0x1] %v3327_v0  ;;  %2583 = vmatprep.subr.mxu1 %v379_v6  ;;  %2528 = vmatpush3.msra.mxu0 %v411_v5  ;;  %v407_v13 = vld [vmem:[#allocation6 + $0x48] sm:$0xff]  ;;  %v3534_v15 = vld [vmem:[%s3519_s7] sm:$0xff] }
  0x6c   : > { %329 = vst [vmem:[#allocation2 + $0x71] sm:$0x1] %v3327_v0  ;;  %330 = vst [vmem:[#allocation2 + $0x89] sm:$0x1] %v3327_v0  ;;  %2584 = vmatpush3.msra.mxu1 %v379_v6  ;;  %2529 = vmatprep.subr.mxu0 %v410_v7  ;;  %v375_v14 = vld [vmem:[#allocation6 + $0xc8] sm:$0xff]  ;;  %v406_v16 = vld [vmem:[#allocation6 + $0x40] sm:$0xff] }
  0x6d   : > { %331 = vst [vmem:[#allocation2 + $0xa1] sm:$0x1] %v3327_v0  ;;  %332 = vst [vmem:[#allocation2 + $0xb9] sm:$0x1] %v3327_v0  ;;  %2585 = vmatprep.subr.mxu1 %v378_v8  ;;  %2530 = vmatpush3.msra.mxu0 %v410_v7  ;;  %v3538_v17 = vld [vmem:[%s3519_s7 + $0x8] sm:$0xff]  ;;  %v374_v18 = vld [vmem:[#allocation6 + $0xc0] sm:$0xff] }
  0x6e   : > { %2586 = vmatpush3.msra.mxu1 %v378_v8  ;;  %2531 = vmatprep.subr.mxu0 %v409_v9  ;;  %349 = vst [vmem:[#allocation2 + $0x1] sm:$0xff] %v3534_v15  ;;  %350 = vst [vmem:[#allocation2 + $0x9] sm:$0xff] %v3538_v17  ;;  %v3542_v19 = vld [vmem:[%s3519_s7 + $0x10] sm:$0xff]  ;;  %v3545_v20 = vld [vmem:[%s3519_s7 + $0x18] sm:$0xff]  ;;  %s2234_s19 = sshll.u32 %s3387_s25, 11  ;;  %s2105_s26 = sshll.u32 %s3747_s8, 4  ;;  %s3802_s26 = int_to_ptr.vmem [resolvable:$true] %s2105_s26 }
  0x6f   : > { %2587 = vmatprep.subr.mxu1 %v377_v10  ;;  %2532 = vmatpush3.msra.mxu0 %v409_v9  ;;  %351 = vst [vmem:[#allocation2 + $0x19] sm:$0xff] %v3542_v19  ;;  %352 = vst [vmem:[#allocation2 + $0x21] sm:$0xff] %v3545_v20  ;;  %v3550_v21 = vld [vmem:[%s3519_s7 + $0x20] sm:$0xff]  ;;  %v3553_v22 = vld [vmem:[%s3519_s7 + $0x28] sm:$0xff]  ;;  %s3800_s10 = scalar_lea.hbm %s3853_s6, %s2234_s19  ;;  %s2091_s18 = scalar_lea.sflag [#allocation5], %s3513_s14 }
  0x70   : > { %2588 = vmatpush3.msra.mxu1 %v377_v10  ;;  %2533 = vmatprep.subr.mxu0 %v408_v11  ;;  %v405_v23 = vld [vmem:[#allocation6 + $0x38] sm:$0xff]  ;;  %353 = vst [vmem:[#allocation2 + $0x31] sm:$0xff] %v3550_v21  ;;  %354 = vst [vmem:[#allocation2 + $0x39] sm:$0xff] %v3553_v22  ;;  %v3558_v25 = vld [vmem:[%s3519_s7 + $0x30] sm:$0xff]  ;;  %s3247_s25 = scalar_lea.vmem %s3802_s26, 2048  ;;  %p3874_p1 = scmp.ne.s32.totalorder %s3864_s13, 0 }
  0x71   : > { %2589 = vmatprep.subr.mxu1 %v376_v12  ;;  %2534 = vmatpush3.msra.mxu0 %v408_v11  ;;  %v373_v24 = vld [vmem:[#allocation6 + $0xb8] sm:$0xff]  ;;  %v404_v26 = vld [vmem:[#allocation6 + $0x30] sm:$0xff]  ;;  %355 = vst [vmem:[#allocation2 + $0x49] sm:$0xff] %v3558_v25  ;;  %v3566_v29 = vld [vmem:[%s3519_s7 + $0x40] sm:$0xff]  ;;  %p3248_p7 = scmp.ne.s32.totalorder %s3802_s26, %s3247_s25  ;;  %s3328_s15 = smov [#allocation11]  }
  0x72   : > { %2590 = vmatpush3.msra.mxu1 %v376_v12  ;;  %2535 = vmatprep.subr.mxu0 %v407_v13  ;;  %v3562_v27 = vld [vmem:[%s3519_s7 + $0x38] sm:$0xff]  ;;  %v372_v28 = vld [vmem:[#allocation6 + $0xb0] sm:$0xff]  ;;  %v3569_v30 = vld [vmem:[%s3519_s7 + $0x48] sm:$0xff]  ;;  %357 = vst [vmem:[#allocation2 + $0x61] sm:$0xff] %v3566_v29  ;;  %s3251_s12 = sshll.u32 %s3328_s15, 4  ;;  %s3252_s12 = int_to_ptr.vmem [resolvable:$false] %s3251_s12 }
  0x73   : > { %2591 = vmatprep.subr.mxu1 %v375_v14  ;;  %2536 = vmatpush3.msra.mxu0 %v407_v13  ;;  %356 = vst [vmem:[#allocation2 + $0x51] sm:$0xff] %v3562_v27  ;;  %358 = vst [vmem:[#allocation2 + $0x69] sm:$0xff] %v3569_v30  ;;  %v3574_v31 = vld [vmem:[%s3519_s7 + $0x50] sm:$0xff]  ;;  %v3577_v32 = vld [vmem:[%s3519_s7 + $0x58] sm:$0xff]  ;;  %p3249_p12 = pnand %p3248_p7, %p3874_p1  ;;  %p3254_p13 = scmp.lt.s32.totalorder %s3802_s26, %s3252_s12 }
  0x74   : > { %2592 = vmatpush3.msra.mxu1 %v375_v14  ;;  %2537 = vmatprep.subr.mxu0 %v406_v16  ;;  %v403_v33 = vld [vmem:[#allocation6 + $0x28] sm:$0xff]  ;;  %359 = vst [vmem:[#allocation2 + $0x79] sm:$0xff] %v3574_v31  ;;  %360 = vst [vmem:[#allocation2 + $0x81] sm:$0xff] %v3577_v32  ;;  %v3582_v35 = vld [vmem:[%s3519_s7 + $0x60] sm:$0xff] }
  0x75   : > { %2593 = vmatprep.subr.mxu1 %v374_v18  ;;  %2538 = vmatpush3.msra.mxu0 %v406_v16  ;;  %v371_v34 = vld [vmem:[#allocation6 + $0xa8] sm:$0xff]  ;;  %v402_v37 = vld [vmem:[#allocation6 + $0x20] sm:$0xff]  ;;  %361 = vst [vmem:[#allocation2 + $0x91] sm:$0xff] %v3582_v35  ;;  %v401_v39 = vld [vmem:[#allocation6 + $0x18] sm:$0xff]  ;;  %p3250_p9 = pneg %p3249_p12 }
  0x76   : > { %2594 = vmatpush3.msra.mxu1 %v374_v18  ;;  %2539 = vmatprep.subr.mxu0 %v405_v23  ;;  %v3585_v36 = vld [vmem:[%s3519_s7 + $0x68] sm:$0xff]  ;;  %v370_v38 = vld [vmem:[#allocation6 + $0xa0] sm:$0xff]  ;;  %v369_v40 = vld [vmem:[#allocation6 + $0x98] sm:$0xff] }
  0x77   : > { %2595 = vmatprep.subr.mxu1 %v373_v24  ;;  %2540 = vmatpush3.msra.mxu0 %v405_v23  ;;  %362 = vst [vmem:[#allocation2 + $0x99] sm:$0xff] %v3585_v36  ;;  %v3590_v41 = vld [vmem:[%s3519_s7 + $0x70] sm:$0xff]  ;;  %v3593_v42 = vld [vmem:[%s3519_s7 + $0x78] sm:$0xff]  ;;  %v399_v45 = vld [vmem:[#allocation6 + $0x8] sm:$0xff]  ;;  %s3253_s7 = scalar_lea.vmem %s3252_s12, 4096 }
  0x78   : > { %2596 = vmatpush3.msra.mxu1 %v373_v24  ;;  %2541 = vmatprep.subr.mxu0 %v404_v26  ;;  %363 = vst [vmem:[#allocation2 + $0xa9] sm:$0xff] %v3590_v41  ;;  %364 = vst [vmem:[#allocation2 + $0xb1] sm:$0xff] %v3593_v42  ;;  %v400_v43 = vld [vmem:[#allocation6 + $0x10] sm:$0xff]  ;;  %v367_v46 = vld [vmem:[#allocation6 + $0x88] sm:$0xff]  ;;  %p3255_p0 = scmp.lt.s32.totalorder %s3253_s7, %s3247_s25 }
  0x79   : > { %2597 = vmatprep.subr.mxu1 %v372_v28  ;;  %2542 = vmatpush3.msra.mxu0 %v404_v26  ;;  %v368_v44 = vld [vmem:[#allocation6 + $0x90] sm:$0xff]  ;;  %v398_v47 = vld [vmem:[#allocation6] sm:$0xff]  ;;  %v383_v50 = vld [vmem:[#allocation2 + $0x8] sm:$0xff] }
  0x7a   : > { %2598 = vmatpush3.msra.mxu1 %v372_v28  ;;  %2543 = vmatprep.subr.mxu0 %v403_v33  ;;  %v366_v48 = vld [vmem:[#allocation6 + $0x80] sm:$0xff]  ;;  %v736_v51 = vld [vmem:[#allocation6 + $0x178] sm:$0xff]  ;;  %v735_v53 = vld [vmem:[#allocation6 + $0x170] sm:$0xff]  ;;  %p3256_p2 = por %p3255_p0, %p3254_p13 }
  0x7b   : > { %2599 = vmatprep.subr.mxu1 %v371_v34  ;;  %2544 = vmatpush3.msra.mxu0 %v403_v33  ;;  %v382_v49 = vld [vmem:[#allocation2] sm:$0xff]  ;;  %v384_v52 = vld [vmem:[#allocation2 + $0x18] sm:$0xff]  ;;  %v734_v55 = vld [vmem:[#allocation6 + $0x168] sm:$0xff] }
  0x7c   : > { %2600 = vmatpush3.msra.mxu1 %v371_v34  ;;  %2545 = vmatprep.subr.mxu0 %v402_v37  ;;  %v385_v54 = vld [vmem:[#allocation2 + $0x20] sm:$0xff]  ;;  %v386_v56 = vld [vmem:[#allocation2 + $0x30] sm:$0xff]  ;;  %v387_v58 = vld [vmem:[#allocation2 + $0x38] sm:$0xff]  ;;  %p3257_p10 = pnand %p3256_p2, %p3250_p9 }
  0x7d   : > { %2601 = vmatprep.subr.mxu1 %v370_v38  ;;  %2546 = vmatpush3.msra.mxu0 %v402_v37  ;;  %v733_v57 = vld [vmem:[#allocation6 + $0x160] sm:$0xff]  ;;  %v732_v59 = vld [vmem:[#allocation6 + $0x158] sm:$0xff]  ;;  %v388_v60 = vld [vmem:[#allocation2 + $0x48] sm:$0xff] }
  0x7e   : > { %2602 = vmatpush3.msra.mxu1 %v370_v38  ;;  %2547 = vmatprep.subr.mxu0 %v401_v39  ;;  %v731_v61 = vld [vmem:[#allocation6 + $0x150] sm:$0xff]  ;;  %v730_v63 = vld [vmem:[#allocation6 + $0x148] sm:$0xff]  ;;  %v390_v0 = vld [vmem:[#allocation2 + $0x60] sm:$0xff] }
  0x7f   : > { %2603 = vmatprep.subr.mxu1 %v369_v40  ;;  %2548 = vmatpush3.msra.mxu0 %v401_v39  ;;  %v389_v62 = vld [vmem:[#allocation2 + $0x50] sm:$0xff]  ;;  %v729_v1 = vld [vmem:[#allocation6 + $0x140] sm:$0xff]  ;;  %v391_v2 = vld [vmem:[#allocation2 + $0x68] sm:$0xff] }
  0x80   : > { %2604 = vmatpush3.msra.mxu1 %v369_v40  ;;  %2549 = vmatprep.subr.mxu0 %v400_v43  ;;  %v728_v3 = vld [vmem:[#allocation6 + $0x138] sm:$0xff]  ;;  %v727_v5 = vld [vmem:[#allocation6 + $0x130] sm:$0xff]  ;;  %v393_v6 = vld [vmem:[#allocation2 + $0x80] sm:$0xff] }
  0x81   : > { %2605 = vmatprep.subr.mxu1 %v368_v44  ;;  %2550 = vmatpush3.msra.mxu0 %v400_v43  ;;  %v392_v4 = vld [vmem:[#allocation2 + $0x78] sm:$0xff]  ;;  %v726_v7 = vld [vmem:[#allocation6 + $0x128] sm:$0xff]  ;;  %v394_v8 = vld [vmem:[#allocation2 + $0x90] sm:$0xff] }
  0x82   : > { %2606 = vmatpush3.msra.mxu1 %v368_v44  ;;  %2551 = vmatprep.subr.mxu0 %v399_v45  ;;  %v725_v9 = vld [vmem:[#allocation6 + $0x120] sm:$0xff]  ;;  %v395_v10 = vld [vmem:[#allocation2 + $0x98] sm:$0xff]  ;;  %v396_v12 = vld [vmem:[#allocation2 + $0xa8] sm:$0xff] }
  0x83   : > { %2607 = vmatprep.subr.mxu1 %v367_v46  ;;  %2552 = vmatpush3.msra.mxu0 %v399_v45  ;;  %v724_v11 = vld [vmem:[#allocation6 + $0x118] sm:$0xff]  ;;  %v723_v13 = vld [vmem:[#allocation6 + $0x110] sm:$0xff]  ;;  %v722_v16 = vld [vmem:[#allocation6 + $0x108] sm:$0xff] }
  0x84   : > { %2608 = vmatpush3.msra.mxu1 %v367_v46  ;;  %2553 = vmatprep.subr.mxu0 %v398_v47  ;;  %v397_v14 = vld [vmem:[#allocation2 + $0xb0] sm:$0xff]  ;;  %v704_v18 = vld [vmem:[#allocation2 + $0x2] sm:$0xff]  ;;  %v706_v26 = vld [vmem:[#allocation2 + $0x1a] sm:$0xff] }
  0x85   : > { %2609 = vmatprep.subr.mxu1 %v366_v48  ;;  %2554 = vmatpush3.msra.mxu0 %v398_v47  ;;  %v721_v23 = vld [vmem:[#allocation6 + $0x100] sm:$0xff]  ;;  %v705_v24 = vld [vmem:[#allocation2 + $0xa] sm:$0xff]  ;;  %v708_v33 = vld [vmem:[#allocation2 + $0x32] sm:$0xff] }
  0x86   : > { %2555 = vmatprep.mubr.f32.mxu0 %v382_v49  ;;  %2610 = vmatpush3.msra.mxu1 %v366_v48  ;;  %v707_v28 = vld [vmem:[#allocation2 + $0x22] sm:$0xff]  ;;  %v709_v34 = vld [vmem:[#allocation2 + $0x3a] sm:$0xff]  ;;  %v710_v37 = vld [vmem:[#allocation2 + $0x4a] sm:$0xff] }
  0x87   : > { %2611 = vmatprep.mubr.f32.mxu1 %v3534_v15  ;;  %2556 = vmatmul.mubr.f32.vlgmr.msra.gmra.mxu0 %v383_v50  ;;  %v711_v38 = vld [vmem:[#allocation2 + $0x52] sm:$0xff]  ;;  %v712_v39 = vld [vmem:[#allocation2 + $0x62] sm:$0xff]  ;;  %v713_v40 = vld [vmem:[#allocation2 + $0x6a] sm:$0xff] }
  0x88   : > { %2612 = vmatmul.mubr.f32.vlgmr.msra.gmra.mxu1 %v3538_v17  ;;  %2635 = vmatprep.subr.mxu0 %v736_v51  ;;  %v714_v43 = vld [vmem:[#allocation2 + $0x7a] sm:$0xff]  ;;  %v715_v44 = vld [vmem:[#allocation2 + $0x82] sm:$0xff]  ;;  %v716_v45 = vld [vmem:[#allocation2 + $0x92] sm:$0xff] }
  0x89   : > { %2558 = vmatprep.mubr.f32.mxu0 %v384_v52  ;;  %2636 = vmatpush3.msra.mxu0 %v736_v51  ;;  %v717_v46 = vld [vmem:[#allocation2 + $0x9a] sm:$0xff]  ;;  %v718_v47 = vld [vmem:[#allocation2 + $0xaa] sm:$0xff]  ;;  %v719_v48 = vld [vmem:[#allocation2 + $0xb2] sm:$0xff] }
  0x8a   : > { %2614 = vmatprep.mubr.f32.mxu1 %v3542_v19  ;;  %2637 = vmatprep.subr.mxu0 %v735_v53  ;;  %v953_v49 = vld [vmem:[#allocation8 + $0xf8] sm:$0xff]  ;;  %v952_v50 = vld [vmem:[#allocation8 + $0xf0] sm:$0xff]  ;;  %v951_v51 = vld [vmem:[#allocation8 + $0xe8] sm:$0xff] }
  0x8b   : > { %2638 = vmatpush3.msra.mxu0 %v735_v53  ;;  %v950_v52 = vld [vmem:[#allocation8 + $0xe0] sm:$0xff]  ;;  %v985_v53 = vld [vmem:[#allocation8 + $0x78] sm:$0xff] }
  0x8c   : > { %2615 = vmatmul.mubr.f32.gmra.mxu1 %v3545_v20  ;;  %2559 = vmatmul.mubr.f32.gmra.mxu0 %v385_v54  ;;  %v949_v54 = vld [vmem:[#allocation8 + $0xd8] sm:$0xff] }
  0x8d   : > { %2639 = vmatprep.subr.mxu0 %v734_v55  ;;  %2561 = vmatprep.mubr.f32.mxu0 %v386_v56  ;;  %v948_v56 = vld [vmem:[#allocation8 + $0xd0] sm:$0xff] }
  0x8e   : > { %2640 = vmatpush3.msra.mxu0 %v734_v55  ;;  %2617 = vmatprep.mubr.f32.mxu1 %v3550_v21  ;;  %v984_v55 = vld [vmem:[#allocation8 + $0x70] sm:$0xff] }
  0x8f   : > { %2641 = vmatprep.subr.mxu0 %v733_v57  ;;  %2691 = vmatprep.subr.mxu1 %v985_v53 }
  0x90   : > { %2642 = vmatpush3.msra.mxu0 %v733_v57  ;;  %2618 = vmatmul.mubr.f32.gmra.mxu1 %v3553_v22  ;;  %v983_v57 = vld [vmem:[#allocation8 + $0x68] sm:$0xff] }
  0x91   : > { %2562 = vmatmul.mubr.f32.gmra.mxu0 %v387_v58  ;;  %2643 = vmatprep.subr.mxu0 %v732_v59  ;;  %v947_v58 = vld [vmem:[#allocation8 + $0xc8] sm:$0xff] }
  0x92   : > { %2644 = vmatpush3.msra.mxu0 %v732_v59  ;;  %2564 = vmatprep.mubr.f32.mxu0 %v388_v60  ;;  %v982_v59 = vld [vmem:[#allocation8 + $0x60] sm:$0xff] }
  0x93   : > { %2645 = vmatprep.subr.mxu0 %v731_v61  ;;  %2620 = vmatprep.mubr.f32.mxu1 %v3558_v25  ;;  %v946_v60 = vld [vmem:[#allocation8 + $0xc0] sm:$0xff] }
  0x94   : > { %2646 = vmatpush3.msra.mxu0 %v731_v61  ;;  %2621 = vmatmul.mubr.f32.gmra.mxu1 %v3562_v27  ;;  %v981_v61 = vld [vmem:[#allocation8 + $0x58] sm:$0xff] }
  0x95   : > { %2565 = vmatmul.mubr.f32.gmra.mxu0 %v389_v62  ;;  %2647 = vmatprep.subr.mxu0 %v730_v63  ;;  %v945_v62 = vld [vmem:[#allocation8 + $0xb8] sm:$0xff] }
  0x96   : > { %2648 = vmatpush3.msra.mxu0 %v730_v63  ;;  %2567 = vmatprep.mubr.f32.mxu0 %v390_v0  ;;  %v980_v63 = vld [vmem:[#allocation8 + $0x50] sm:$0xff] }
  0x97   : > { %2649 = vmatprep.subr.mxu0 %v729_v1  ;;  %2623 = vmatprep.mubr.f32.mxu1 %v3566_v29  ;;  %v944_v0 = vld [vmem:[#allocation8 + $0xb0] sm:$0xff] }
  0x98   : > { %2650 = vmatpush3.msra.mxu0 %v729_v1  ;;  %2624 = vmatmul.mubr.f32.gmra.mxu1 %v3569_v30  ;;  %v979_v1 = vld [vmem:[#allocation8 + $0x48] sm:$0xff] }
  0x99   : > { %2568 = vmatmul.mubr.f32.gmra.mxu0 %v391_v2  ;;  %2651 = vmatprep.subr.mxu0 %v728_v3  ;;  %v943_v2 = vld [vmem:[#allocation8 + $0xa8] sm:$0xff] }
  0x9a   : > { %2652 = vmatpush3.msra.mxu0 %v728_v3  ;;  %2570 = vmatprep.mubr.f32.mxu0 %v392_v4  ;;  %v978_v3 = vld [vmem:[#allocation8 + $0x40] sm:$0xff] }
  0x9b   : > { %2653 = vmatprep.subr.mxu0 %v727_v5  ;;  %2626 = vmatprep.mubr.f32.mxu1 %v3574_v31  ;;  %v942_v4 = vld [vmem:[#allocation8 + $0xa0] sm:$0xff] }
  0x9c   : > { %2654 = vmatpush3.msra.mxu0 %v727_v5  ;;  %2627 = vmatmul.mubr.f32.gmra.mxu1 %v3577_v32  ;;  %v977_v5 = vld [vmem:[#allocation8 + $0x38] sm:$0xff] }
  0x9d   : > { %2571 = vmatmul.mubr.f32.gmra.mxu0 %v393_v6  ;;  %2655 = vmatprep.subr.mxu0 %v726_v7  ;;  %v941_v6 = vld [vmem:[#allocation8 + $0x98] sm:$0xff] }
  0x9e   : > { %2656 = vmatpush3.msra.mxu0 %v726_v7  ;;  %2573 = vmatprep.mubr.f32.mxu0 %v394_v8  ;;  %v976_v7 = vld [vmem:[#allocation8 + $0x30] sm:$0xff] }
  0x9f   : > { %2657 = vmatprep.subr.mxu0 %v725_v9  ;;  %2629 = vmatprep.mubr.f32.mxu1 %v3582_v35  ;;  %v940_v8 = vld [vmem:[#allocation8 + $0x90] sm:$0xff] }
  0xa0   : > { %2658 = vmatpush3.msra.mxu0 %v725_v9  ;;  %2630 = vmatmul.mubr.f32.gmra.mxu1 %v3585_v36  ;;  %v975_v9 = vld [vmem:[#allocation8 + $0x28] sm:$0xff] }
  0xa1   : > { %2574 = vmatmul.mubr.f32.gmra.mxu0 %v395_v10  ;;  %2659 = vmatprep.subr.mxu0 %v724_v11  ;;  %v939_v10 = vld [vmem:[#allocation8 + $0x88] sm:$0xff] }
  0xa2   : > { %2660 = vmatpush3.msra.mxu0 %v724_v11  ;;  %2576 = vmatprep.mubr.f32.mxu0 %v396_v12  ;;  %v974_v11 = vld [vmem:[#allocation8 + $0x20] sm:$0xff] }
  0xa3   : > { %2661 = vmatprep.subr.mxu0 %v723_v13  ;;  %2632 = vmatprep.mubr.f32.mxu1 %v3590_v41  ;;  %v938_v12 = vld [vmem:[#allocation8 + $0x80] sm:$0xff] }
  0xa4   : > { %2662 = vmatpush3.msra.mxu0 %v723_v13  ;;  %2633 = vmatmul.mubr.f32.gmra.mxu1 %v3593_v42  ;;  %v973_v13 = vld [vmem:[#allocation8 + $0x18] sm:$0xff] }
  0xa5   : > { %2577 = vmatmul.mubr.f32.gmra.mxu0 %v397_v14  ;;  %2663 = vmatprep.subr.mxu0 %v722_v16  ;;  %v972_v14 = vld [vmem:[#allocation8 + $0x10] sm:$0xff] }
  0xa6   : > { %2664 = vmatpush3.msra.mxu0 %v722_v16  ;;  %2667 = vmatprep.mubr.f32.mxu0 %v704_v18  ;;  %v971_v16 = vld [vmem:[#allocation8 + $0x8] sm:$0xff]  ;;  %v970_v18 = vld [vmem:[#allocation8] sm:$0xff] }
  0xa7   : > { %2665 = vmatprep.subr.mxu0 %v721_v23  ;;  %2692 = vmatpush3.msra.mxu1 %v985_v53 }
  0xa8   : > { %2666 = vmatpush3.msra.mxu0 %v721_v23  ;;  %2693 = vmatprep.subr.mxu1 %v984_v55  ;;  %v3613_v23 = vld [vmem:[#allocation8 + $0x178] sm:$0xff] }
  0xa9   : > { %2668 = vmatmul.mubr.f32.vlgmr.msra.gmra.mxu0 %v705_v24  ;;  %2747 = vmatprep.subr.mxu0 %v953_v49 }
  0xaa   : > { %2670 = vmatprep.mubr.f32.mxu0 %v706_v26  ;;  %2748 = vmatpush3.msra.mxu0 %v953_v49 }
  0xab   : > { %2749 = vmatprep.subr.mxu0 %v952_v50  ;;  %2694 = vmatpush3.msra.mxu1 %v984_v55 }
  0xac   : > { %2750 = vmatpush3.msra.mxu0 %v952_v50  ;;  %2695 = vmatprep.subr.mxu1 %v983_v57 }
  0xad   : > { %2671 = vmatmul.mubr.f32.gmra.mxu0 %v707_v28  ;;  %2751 = vmatprep.subr.mxu0 %v951_v51 }
  0xae   : > { %2673 = vmatprep.mubr.f32.mxu0 %v708_v33  ;;  %2752 = vmatpush3.msra.mxu0 %v951_v51 }
  0xaf   : > { %2753 = vmatprep.subr.mxu0 %v950_v52  ;;  %2696 = vmatpush3.msra.mxu1 %v983_v57 }
  0xb0   : > { %2754 = vmatpush3.msra.mxu0 %v950_v52  ;;  %2697 = vmatprep.subr.mxu1 %v982_v59 }
  0xb1   : > { %2674 = vmatmul.mubr.f32.gmra.mxu0 %v709_v34  ;;  %2755 = vmatprep.subr.mxu0 %v949_v54 }
  0xb2   : > { %2676 = vmatprep.mubr.f32.mxu0 %v710_v37  ;;  %2756 = vmatpush3.msra.mxu0 %v949_v54 }
  0xb3   : > { %2757 = vmatprep.subr.mxu0 %v948_v56  ;;  %2698 = vmatpush3.msra.mxu1 %v982_v59 }
  0xb4   : > { %2758 = vmatpush3.msra.mxu0 %v948_v56  ;;  %2699 = vmatprep.subr.mxu1 %v981_v61 }
  0xb5   : > { %2677 = vmatmul.mubr.f32.gmra.mxu0 %v711_v38  ;;  %2759 = vmatprep.subr.mxu0 %v947_v58 }
  0xb6   : > { %2679 = vmatprep.mubr.f32.mxu0 %v712_v39  ;;  %2760 = vmatpush3.msra.mxu0 %v947_v58 }
  0xb7   : > { %2761 = vmatprep.subr.mxu0 %v946_v60  ;;  %2700 = vmatpush3.msra.mxu1 %v981_v61  ;;  %v3633_v61 = vld [vmem:[%s3851_s4] ss:$0 sm:$0xff] }
  0xb8   : > { %2762 = vmatpush3.msra.mxu0 %v946_v60  ;;  %2701 = vmatprep.subr.mxu1 %v980_v63 }
  0xb9   : > { %2680 = vmatmul.mubr.f32.gmra.mxu0 %v713_v40  ;;  %2763 = vmatprep.subr.mxu0 %v945_v62 }
  0xba   : > { %2682 = vmatprep.mubr.f32.mxu0 %v714_v43  ;;  %2764 = vmatpush3.msra.mxu0 %v945_v62 }
  0xbb   : > { %2765 = vmatprep.subr.mxu0 %v944_v0  ;;  %2702 = vmatpush3.msra.mxu1 %v980_v63 }
  0xbc   : > { %2766 = vmatpush3.msra.mxu0 %v944_v0  ;;  %2703 = vmatprep.subr.mxu1 %v979_v1 }
  0xbd   : > { %2683 = vmatmul.mubr.f32.gmra.mxu0 %v715_v44  ;;  %2767 = vmatprep.subr.mxu0 %v943_v2 }
  0xbe   : > { %2685 = vmatprep.mubr.f32.mxu0 %v716_v45  ;;  %2704 = vmatpush3.msra.mxu1 %v979_v1 }
  0xbf   : > { %2768 = vmatpush3.msra.mxu0 %v943_v2  ;;  %2705 = vmatprep.subr.mxu1 %v978_v3 }
  0xc0   : > { %2769 = vmatprep.subr.mxu0 %v942_v4  ;;  %2706 = vmatpush3.msra.mxu1 %v978_v3 }
  0xc1   : > { %2686 = vmatmul.mubr.f32.gmra.mxu0 %v717_v46  ;;  %2707 = vmatprep.subr.mxu1 %v977_v5 }
  0xc2   : > { %2688 = vmatprep.mubr.f32.mxu0 %v718_v47  ;;  %2770 = vmatpush3.msra.mxu0 %v942_v4 }
  0xc3   : > { %2771 = vmatprep.subr.mxu0 %v941_v6  ;;  %2708 = vmatpush3.msra.mxu1 %v977_v5 }
  0xc4   : > { %2772 = vmatpush3.msra.mxu0 %v941_v6  ;;  %2709 = vmatprep.subr.mxu1 %v976_v7 }
  0xc5   : > { %2689 = vmatmul.mubr.f32.gmra.mxu0 %v719_v48  ;;  %2773 = vmatprep.subr.mxu0 %v940_v8 }
  0xc6   : > { %2710 = vmatpush3.msra.mxu1 %v976_v7  ;;  %2774 = vmatpush3.msra.mxu0 %v940_v8 }
  0xc7   : > { %2711 = vmatprep.subr.mxu1 %v975_v9  ;;  %2775 = vmatprep.subr.mxu0 %v939_v10 }
  0xc8   : > { %2712 = vmatpush3.msra.mxu1 %v975_v9  ;;  %2776 = vmatpush3.msra.mxu0 %v939_v10 }
  0xc9   : > { %2713 = vmatprep.subr.mxu1 %v974_v11  ;;  %2777 = vmatprep.subr.mxu0 %v938_v12 }
  0xca   : > { %2714 = vmatpush3.msra.mxu1 %v974_v11  ;;  %2778 = vmatpush3.msra.mxu0 %v938_v12 }
  0xcb   : > { %2715 = vmatprep.subr.mxu1 %v973_v13 }
  0xcc   : > { %2716 = vmatpush3.msra.mxu1 %v973_v13 }
  0xcd   : > { %2717 = vmatprep.subr.mxu1 %v972_v14 }
  0xce   : > { %2718 = vmatpush3.msra.mxu1 %v972_v14 }
  0xcf   : > { %2719 = vmatprep.subr.mxu1 %v971_v16 }
  0xd0   : > { %2720 = vmatpush3.msra.mxu1 %v971_v16 }
  0xd1   : > { %2721 = vmatprep.subr.mxu1 %v970_v18 }
  0xd2   : > { %2722 = vmatpush3.msra.mxu1 %v970_v18 }
  0xd3   : > { %2803 = vmatprep.subr.mxu1 %v3613_v23 }
 0x147   : > { %v2557_v24 = vpop.f32.mrf.mxu0 }
 0x148   : > { %v2613_v26 = vpop.f32.mrf.mxu1 }
 0x149   : > { %v480_v28 = vpop.f32.mrf.mxu0  ;;  %v631_v59 = vadd.f32 %v2613_v26, %v2557_v24 }
 0x14a   : > { %v625_v33 = vpop.f32.mrf.mxu1 }
 0x14b   : > { %v626_v62 = vadd.f32 %v625_v33, %v480_v28 }
 0x14c   : > { %v2560_v34 = vpop.f32.mrf.mxu0  ;;  %v2616_v37 = vpop.f32.mrf.mxu1 }
 0x14d   : > { %v641_v2 = vadd.f32 %v2616_v37, %v2560_v34 }
 0x14e   : > { %v490_v38 = vpop.f32.mrf.mxu0  ;;  %v635_v40 = vpop.f32.mrf.mxu1 }
 0x14f   : > { %v636_v6 = vadd.f32 %v635_v40, %v490_v38 }
 0x150   : > { %v2619_v45 = vpop.f32.mrf.mxu1 }
 0x151   : > { %v2563_v39 = vpop.f32.mrf.mxu0 }
 0x152   : > { %v645_v48 = vpop.f32.mrf.mxu1  ;;  %v651_v11 = vadd.f32 %v2619_v45, %v2563_v39 }
 0x153   : > { %v500_v43 = vpop.f32.mrf.mxu0 }
 0x154   : > { %v2622_v51 = vpop.f32.mrf.mxu1  ;;  %v646_v16 = vadd.f32 %v645_v48, %v500_v43 }
 0x155   : > { %v2566_v44 = vpop.f32.mrf.mxu0 }
 0x156   : > { %v655_v54 = vpop.f32.mrf.mxu1  ;;  %v661_v33 = vadd.f32 %v2622_v51, %v2566_v44 }
 0x157   : > { %v510_v46 = vpop.f32.mrf.mxu0 }
 0x158   : > { %v2625_v57 = vpop.f32.mrf.mxu1  ;;  %v656_v39 = vadd.f32 %v655_v54, %v510_v46 }
 0x159   : > { %v2569_v47 = vpop.f32.mrf.mxu0 }
 0x15a   : > { %v665_v0 = vpop.f32.mrf.mxu1 }
 0x15b   : > { %v3616_v49 = vpop.f32.mrf.mxu0 }
 0x15c   : > { %v2628_v9 = vpop.f32.mrf.mxu1  ;;  %v666_v46 = vadd.f32 %v665_v0, %v3616_v49  ;;  %v1305_v0 = vld [vmem:[#allocation8 + $0x160] sm:$0xff] }
 0x15d   : > { %v3618_v50 = vpop.f32.mrf.mxu0 }
 0x15e   : > { %v675_v26 = vpop.f32.mrf.mxu1 }
 0x15f   : > { %v3620_v52 = vpop.f32.mrf.mxu0 }
 0x160   : > { %v2631_v43 = vpop.f32.mrf.mxu1 }
 0x161   : > { %v3622_v53 = vpop.f32.mrf.mxu0 }
 0x163   : > { %v3624_v55 = vpop.f32.mrf.mxu0 }
 0x165   : > { %v3626_v56 = vpop.f32.mrf.mxu0 }
 0x167   : > { %v3628_v58 = vpop.f32.mrf.mxu0 }
 0x169   : > { %v2669_v60 = vpop.f32.mrf.mxu0 }
 0x16a   : > { %v883_v63 = vadd.f32 %v2669_v60, %v631_v59 }
 0x16b   : > { %v803_v1 = vpop.f32.mrf.mxu0 }
 0x16c   : > { %v906_v3 = vadd.f32 %v3633_v61, %v883_v63  ;;  %v882_v4 = vadd.f32 %v803_v1, %v626_v62  ;;  %v671_v62 = vadd.f32 %v2625_v57, %v2569_v47  ;;  %v1307_v63 = vld [vmem:[#allocation8 + $0x170] sm:$0xff] }
 0x16d   : > { %v2672_v5 = vpop.f32.mrf.mxu0 }
 0x16e   : > { %922 = vst [vmem:[#allocation2 + $0x9] sm:$0xff] %v906_v3  ;;  %v905_v7 = vadd.f32 %v3633_v61, %v882_v4  ;;  %v885_v8 = vadd.f32 %v2672_v5, %v641_v2  ;;  %v1306_v5 = vld [vmem:[#allocation8 + $0x168] sm:$0xff] }
 0x16f   : > { %v813_v10 = vpop.f32.mrf.mxu0 }
 0x170   : > { %921 = vst [vmem:[#allocation2 + $0x1] sm:$0xff] %v905_v7  ;;  %v908_v12 = vadd.f32 %v3633_v61, %v885_v8  ;;  %v884_v13 = vadd.f32 %v813_v10, %v636_v6  ;;  %2779 = vmatprep.mubr.f32.mxu0 %v905_v7  ;;  %v681_v6 = vadd.f32 %v2628_v9, %v3618_v50 }
 0x171   : > { %v2675_v14 = vpop.f32.mrf.mxu0  ;;  %2780 = vmatmul.mubr.f32.vlgmr.msra.gmra.mxu0 %v906_v3  ;;  %v685_v3 = vpop.f32.mrf.mxu1 }
 0x172   : > { %924 = vst [vmem:[#allocation2 + $0x21] sm:$0xff] %v908_v12  ;;  %v907_v18 = vadd.f32 %v3633_v61, %v884_v13  ;;  %v887_v24 = vadd.f32 %v2675_v14, %v651_v11  ;;  %v691_v14 = vadd.f32 %v2631_v43, %v3622_v53  ;;  %v1302_v43 = vld [vmem:[#allocation8 + $0x148] sm:$0xff] }
 0x173   : > { %v823_v28 = vpop.f32.mrf.mxu0 }
 0x174   : > { %923 = vst [vmem:[#allocation2 + $0x19] sm:$0xff] %v907_v18  ;;  %v910_v34 = vadd.f32 %v3633_v61, %v887_v24  ;;  %v886_v37 = vadd.f32 %v823_v28, %v646_v16  ;;  %2782 = vmatprep.mubr.f32.mxu0 %v907_v18 }
 0x175   : > { %v2678_v38 = vpop.f32.mrf.mxu0  ;;  %2783 = vmatmul.mubr.f32.gmra.mxu0 %v908_v12  ;;  %v2634_v12 = vpop.f32.mrf.mxu1 }
 0x176   : > { %926 = vst [vmem:[#allocation2 + $0x39] sm:$0xff] %v910_v34  ;;  %v909_v40 = vadd.f32 %v3633_v61, %v886_v37  ;;  %v889_v45 = vadd.f32 %v2678_v38, %v661_v33 }
 0x177   : > { %v833_v48 = vpop.f32.mrf.mxu0  ;;  %v954_v59 = vld [vmem:[#allocation2] sm:$0xff]  ;;  %v955_v60 = vld [vmem:[#allocation2 + $0x8] sm:$0xff]  ;;  %v695_v53 = vpop.f32.mrf.mxu1 }
 0x178   : > { %925 = vst [vmem:[#allocation2 + $0x31] sm:$0xff] %v909_v40  ;;  %v912_v44 = vadd.f32 %v3633_v61, %v889_v45  ;;  %v888_v51 = vadd.f32 %v833_v48, %v656_v39  ;;  %2723 = vmatprep.mubr.f32.mxu1 %v954_v59  ;;  %2785 = vmatprep.mubr.f32.mxu0 %v909_v40 }
 0x179   : > { %v2681_v1 = vpop.f32.mrf.mxu0  ;;  %2724 = vmatmul.mubr.f32.vlgmr.msra.gmra.mxu1 %v955_v60  ;;  %2786 = vmatmul.mubr.f32.gmra.mxu0 %v910_v34  ;;  %v1303_v34 = vld [vmem:[#allocation8 + $0x150] sm:$0xff]  ;;  %v701_v39 = vadd.f32 %v2634_v12, %v3626_v56  ;;  %v696_v59 = vadd.f32 %v695_v53, %v3628_v58  ;;  %v1301_v56 = vld [vmem:[#allocation8 + $0x140] sm:$0xff] }
 0x17a   : > { %928 = vst [vmem:[#allocation2 + $0x51] sm:$0xff] %v912_v44  ;;  %v911_v54 = vadd.f32 %v3633_v61, %v888_v51  ;;  %v891_v2 = vadd.f32 %v2681_v1, %v671_v62  ;;  %2804 = vmatpush3.msra.mxu1 %v3613_v23  ;;  %v676_v23 = vadd.f32 %v675_v26, %v3620_v52  ;;  %v1304_v52 = vld [vmem:[#allocation8 + $0x158] sm:$0xff] }
 0x17b   : > { %v843_v47 = vpop.f32.mrf.mxu0  ;;  %2805 = vmatprep.subr.mxu1 %v1307_v63  ;;  %v956_v57 = vld [vmem:[#allocation2 + $0x18] sm:$0xff]  ;;  %v957_v4 = vld [vmem:[#allocation2 + $0x20] sm:$0xff]  ;;  %v686_v26 = vadd.f32 %v685_v3, %v3624_v55 }
 0x17c   : > { %927 = vst [vmem:[#allocation2 + $0x49] sm:$0xff] %v911_v54  ;;  %v914_v7 = vadd.f32 %v3633_v61, %v891_v2  ;;  %v890_v8 = vadd.f32 %v843_v47, %v666_v46  ;;  %2726 = vmatprep.mubr.f32.mxu1 %v956_v57  ;;  %2788 = vmatprep.mubr.f32.mxu0 %v911_v54  ;;  %v1300_v54 = vld [vmem:[#allocation8 + $0x138] sm:$0xff]  ;;  %v1299_v2 = vld [vmem:[#allocation8 + $0x130] sm:$0xff]  ;;  %v1298_v57 = vld [vmem:[#allocation8 + $0x128] sm:$0xff] }
 0x17d   : > { %2806 = vmatpush3.msra.mxu1 %v1307_v63  ;;  %v2684_v49 = vpop.f32.mrf.mxu0  ;;  %2789 = vmatmul.mubr.f32.gmra.mxu0 %v912_v44  ;;  %v1278_v12 = vld [vmem:[#allocation2 + $0x1a] sm:$0xff] }
 0x17e   : > { %930 = vst [vmem:[#allocation2 + $0x69] sm:$0xff] %v914_v7  ;;  %v913_v10 = vadd.f32 %v3633_v61, %v890_v8  ;;  %v893_v11 = vadd.f32 %v2684_v49, %v681_v6  ;;  %2727 = vmatmul.mubr.f32.gmra.mxu1 %v957_v4  ;;  %2807 = vmatprep.subr.mxu1 %v1306_v5  ;;  %v1297_v4 = vld [vmem:[#allocation8 + $0x120] sm:$0xff]  ;;  %v1296_v6 = vld [vmem:[#allocation8 + $0x118] sm:$0xff] }
 0x17f   : > { %2808 = vmatpush3.msra.mxu1 %v1306_v5  ;;  %v853_v50 = vpop.f32.mrf.mxu0  ;;  %v958_v9 = vld [vmem:[#allocation2 + $0x30] sm:$0xff]  ;;  %v959_v13 = vld [vmem:[#allocation2 + $0x38] sm:$0xff] }
 0x180   : > { %929 = vst [vmem:[#allocation2 + $0x61] sm:$0xff] %v913_v10  ;;  %v916_v16 = vadd.f32 %v3633_v61, %v893_v11  ;;  %v892_v18 = vadd.f32 %v853_v50, %v676_v23  ;;  %2809 = vmatprep.subr.mxu1 %v1305_v0  ;;  %2729 = vmatprep.mubr.f32.mxu1 %v958_v9  ;;  %v1293_v23 = vld [vmem:[#allocation8 + $0x100] sm:$0xff]  ;;  %v1277_v11 = vld [vmem:[#allocation2 + $0xa] sm:$0xff]  ;;  %v1280_v9 = vld [vmem:[#allocation2 + $0x32] sm:$0xff] }
 0x181   : > { %2791 = vmatprep.mubr.f32.mxu0 %v913_v10  ;;  %2810 = vmatpush3.msra.mxu1 %v1305_v0  ;;  %v2687_v24 = vpop.f32.mrf.mxu0  ;;  %v1294_v0 = vld [vmem:[#allocation8 + $0x108] sm:$0xff] }
 0x182   : > { %932 = vst [vmem:[#allocation2 + $0x81] sm:$0xff] %v916_v16  ;;  %v915_v28 = vadd.f32 %v3633_v61, %v892_v18  ;;  %v895_v33 = vadd.f32 %v2687_v24, %v691_v14  ;;  %2730 = vmatmul.mubr.f32.gmra.mxu1 %v959_v13  ;;  %2792 = vmatmul.mubr.f32.gmra.mxu0 %v914_v7  ;;  %v1295_v7 = vld [vmem:[#allocation8 + $0x110] sm:$0xff]  ;;  %v1276_v10 = vld [vmem:[#allocation2 + $0x2] sm:$0xff]  ;;  %v1281_v13 = vld [vmem:[#allocation2 + $0x3a] sm:$0xff] }
 0x183   : > { %2811 = vmatprep.subr.mxu1 %v1304_v52  ;;  %v863_v37 = vpop.f32.mrf.mxu0  ;;  %v960_v38 = vld [vmem:[#allocation2 + $0x48] sm:$0xff]  ;;  %v961_v55 = vld [vmem:[#allocation2 + $0x50] sm:$0xff] }
 0x184   : > { %931 = vst [vmem:[#allocation2 + $0x79] sm:$0xff] %v915_v28  ;;  %v918_v40 = vadd.f32 %v3633_v61, %v895_v33  ;;  %2812 = vmatpush3.msra.mxu1 %v1304_v52  ;;  %v894_v45 = vadd.f32 %v863_v37, %v686_v26  ;;  %2732 = vmatprep.mubr.f32.mxu1 %v960_v38  ;;  %v1279_v50 = vld [vmem:[#allocation2 + $0x22] sm:$0xff]  ;;  %v1282_v14 = vld [vmem:[#allocation2 + $0x4a] sm:$0xff]  ;;  %v1502_v37 = vld [vmem:[#allocation9 + $0xf8] sm:$0xff] }
 0x185   : > { %2813 = vmatprep.subr.mxu1 %v1303_v34  ;;  %2794 = vmatprep.mubr.f32.mxu0 %v915_v28  ;;  %v2690_v48 = vpop.f32.mrf.mxu0  ;;  %v1285_v52 = vld [vmem:[#allocation2 + $0x6a] sm:$0xff] }
 0x186   : > { %934 = vst [vmem:[#allocation2 + $0x99] sm:$0xff] %v918_v40  ;;  %v917_v60 = vadd.f32 %v3633_v61, %v894_v45  ;;  %2814 = vmatpush3.msra.mxu1 %v1303_v34  ;;  %v897_v62 = vadd.f32 %v2690_v48, %v701_v39  ;;  %2795 = vmatmul.mubr.f32.gmra.mxu0 %v916_v16  ;;  %v1283_v16 = vld [vmem:[#allocation2 + $0x52] sm:$0xff]  ;;  %v1500_v39 = vld [vmem:[#allocation9 + $0xe8] sm:$0xff] }
 0x187   : > { %2733 = vmatmul.mubr.f32.gmra.mxu1 %v961_v55  ;;  %2815 = vmatprep.subr.mxu1 %v1302_v43  ;;  %v873_v44 = vpop.f32.mrf.mxu0  ;;  %v962_v51 = vld [vmem:[#allocation2 + $0x60] sm:$0xff]  ;;  %v963_v46 = vld [vmem:[#allocation2 + $0x68] sm:$0xff]  ;;  %v1501_v38 = vld [vmem:[#allocation9 + $0xf0] sm:$0xff] }
 0x188   : > { %933 = vst [vmem:[#allocation2 + $0x91] sm:$0xff] %v917_v60  ;;  %v920_v63 = vadd.f32 %v3633_v61, %v897_v62  ;;  %2816 = vmatpush3.msra.mxu1 %v1302_v43  ;;  %v896_v1 = vadd.f32 %v873_v44, %v696_v59  ;;  %2735 = vmatprep.mubr.f32.mxu1 %v962_v51  ;;  %v1284_v18 = vld [vmem:[#allocation2 + $0x62] sm:$0xff]  ;;  %v1534_v45 = vld [vmem:[#allocation9 + $0x78] sm:$0xff]  ;;  %v1533_v43 = vld [vmem:[#allocation9 + $0x70] sm:$0xff] }
 0x189   : > { %2817 = vmatprep.subr.mxu1 %v1301_v56  ;;  %2797 = vmatprep.mubr.f32.mxu0 %v917_v60  ;;  %v1287_v26 = vld [vmem:[#allocation2 + $0x82] sm:$0xff]  ;;  %v1498_v55 = vld [vmem:[#allocation9 + $0xd8] sm:$0xff]  ;;  %v1497_v48 = vld [vmem:[#allocation9 + $0xd0] sm:$0xff] }
 0x18a   : > { %936 = vst [vmem:[#allocation2 + $0xb1] sm:$0xff] %v920_v63  ;;  %v919_v58 = vadd.f32 %v3633_v61, %v896_v1  ;;  %2818 = vmatpush3.msra.mxu1 %v1301_v56  ;;  %2798 = vmatmul.mubr.f32.gmra.mxu0 %v918_v40  ;;  %v1499_v40 = vld [vmem:[#allocation9 + $0xe0] sm:$0xff]  ;;  %v1532_v59 = vld [vmem:[#allocation9 + $0x68] sm:$0xff]  ;;  %v1530_v44 = vld [vmem:[#allocation9 + $0x58] sm:$0xff] }
 0x18b   : > { %2736 = vmatmul.mubr.f32.gmra.mxu1 %v963_v46  ;;  %2819 = vmatprep.subr.mxu1 %v1300_v54  ;;  %v964_v3 = vld [vmem:[#allocation2 + $0x78] sm:$0xff]  ;;  %v965_v47 = vld [vmem:[#allocation2 + $0x80] sm:$0xff]  ;;  %v1496_v60 = vld [vmem:[#allocation9 + $0xc8] sm:$0xff] }
 0x18c   : > { %935 = vst [vmem:[#allocation2 + $0xa9] sm:$0xff] %v919_v58  ;;  %2820 = vmatpush3.msra.mxu1 %v1300_v54  ;;  %2738 = vmatprep.mubr.f32.mxu1 %v964_v3  ;;  %v1286_v24 = vld [vmem:[#allocation2 + $0x7a] sm:$0xff]  ;;  %v1493_v1 = vld [vmem:[#allocation9 + $0xb0] sm:$0xff]  ;;  %v1528_v46 = vld [vmem:[#allocation9 + $0x48] sm:$0xff] }
 0x18d   : > { %2821 = vmatprep.subr.mxu1 %v1299_v2  ;;  %2800 = vmatprep.mubr.f32.mxu0 %v919_v58  ;;  %v1289_v33 = vld [vmem:[#allocation2 + $0x9a] sm:$0xff]  ;;  %v1492_v54 = vld [vmem:[#allocation9 + $0xa8] sm:$0xff] }
 0x18e   : > { %2822 = vmatpush3.msra.mxu1 %v1299_v2  ;;  %2801 = vmatmul.mubr.f32.gmra.mxu0 %v920_v63  ;;  %v1531_v62 = vld [vmem:[#allocation9 + $0x60] sm:$0xff]  ;;  %v1494_v51 = vld [vmem:[#allocation9 + $0xb8] sm:$0xff]  ;;  %v1529_v63 = vld [vmem:[#allocation9 + $0x50] sm:$0xff] }
 0x18f   : > { %2739 = vmatmul.mubr.f32.gmra.mxu1 %v965_v47  ;;  %2823 = vmatprep.subr.mxu1 %v1298_v57  ;;  %v966_v5 = vld [vmem:[#allocation2 + $0x90] sm:$0xff]  ;;  %v967_v61 = vld [vmem:[#allocation2 + $0x98] sm:$0xff]  ;;  %v1495_v56 = vld [vmem:[#allocation9 + $0xc0] sm:$0xff] }
 0x190   : > { %2824 = vmatpush3.msra.mxu1 %v1298_v57  ;;  %2741 = vmatprep.mubr.f32.mxu1 %v966_v5  ;;  %v1288_v28 = vld [vmem:[#allocation2 + $0x92] sm:$0xff]  ;;  %v1527_v58 = vld [vmem:[#allocation9 + $0x40] sm:$0xff]  ;;  %v1524_v5 = vld [vmem:[#allocation9 + $0x28] sm:$0xff] }
 0x191   : > { %2825 = vmatprep.subr.mxu1 %v1297_v4  ;;  %v1291_v53 = vld [vmem:[#allocation2 + $0xb2] sm:$0xff]  ;;  %2859 = vmatprep.subr.mxu0 %v1534_v45  ;;  %v1491_v2 = vld [vmem:[#allocation9 + $0xa0] sm:$0xff] }
 0x192   : > { %2826 = vmatpush3.msra.mxu1 %v1297_v4  ;;  %2860 = vmatpush3.msra.mxu0 %v1534_v45  ;;  %v1526_v3 = vld [vmem:[#allocation9 + $0x38] sm:$0xff]  ;;  %v1525_v57 = vld [vmem:[#allocation9 + $0x30] sm:$0xff] }
 0x193   : > { %2742 = vmatmul.mubr.f32.gmra.mxu1 %v967_v61  ;;  %2827 = vmatprep.subr.mxu1 %v1296_v6  ;;  %v968_v8 = vld [vmem:[#allocation2 + $0xa8] sm:$0xff]  ;;  %v969_v49 = vld [vmem:[#allocation2 + $0xb0] sm:$0xff]  ;;  %v1490_v47 = vld [vmem:[#allocation9 + $0x98] sm:$0xff] }
 0x194   : > { %2828 = vmatpush3.msra.mxu1 %v1296_v6  ;;  %2744 = vmatprep.mubr.f32.mxu1 %v968_v8  ;;  %v1290_v34 = vld [vmem:[#allocation2 + $0xaa] sm:$0xff]  ;;  %v1523_v6 = vld [vmem:[#allocation9 + $0x20] sm:$0xff]  ;;  %v1522_v8 = vld [vmem:[#allocation9 + $0x18] sm:$0xff] }
 0x195   : > { %2829 = vmatprep.subr.mxu1 %v1295_v7  ;;  %2861 = vmatprep.subr.mxu0 %v1533_v43  ;;  %v1489_v4 = vld [vmem:[#allocation9 + $0x90] sm:$0xff]  ;;  %v1488_v61 = vld [vmem:[#allocation9 + $0x88] sm:$0xff] }
 0x196   : > { %2830 = vmatpush3.msra.mxu1 %v1295_v7  ;;  %2862 = vmatpush3.msra.mxu0 %v1533_v43  ;;  %v1487_v7 = vld [vmem:[#allocation9 + $0x80] sm:$0xff] }
 0x197   : > { %2745 = vmatmul.mubr.f32.gmra.mxu1 %v969_v49  ;;  %2831 = vmatprep.subr.mxu1 %v1294_v0  ;;  %v3659_v49 = vld [vmem:[#allocation9 + $0x178] sm:$0xff] }
 0x198   : > { %2832 = vmatpush3.msra.mxu1 %v1294_v0  ;;  %2835 = vmatprep.mubr.f32.mxu1 %v1276_v10  ;;  %v1521_v0 = vld [vmem:[#allocation9 + $0x10] sm:$0xff]  ;;  %v1519_v10 = vld [vmem:[#allocation9] sm:$0xff] }
 0x199   : > { %2833 = vmatprep.subr.mxu1 %v1293_v23  ;;  %2863 = vmatprep.subr.mxu0 %v1532_v59 }
 0x19a   : > { %2834 = vmatpush3.msra.mxu1 %v1293_v23  ;;  %2864 = vmatpush3.msra.mxu0 %v1532_v59  ;;  %v1520_v23 = vld [vmem:[#allocation9 + $0x8] sm:$0xff] }
 0x19b   : > { %2836 = vmatmul.mubr.f32.vlgmr.msra.gmra.mxu1 %v1277_v11  ;;  %2915 = vmatprep.subr.mxu1 %v1502_v37 }
 0x19c   : > { %2838 = vmatprep.mubr.f32.mxu1 %v1278_v12  ;;  %2916 = vmatpush3.msra.mxu1 %v1502_v37 }
 0x19d   : > { %2917 = vmatprep.subr.mxu1 %v1501_v38  ;;  %2865 = vmatprep.subr.mxu0 %v1531_v62 }
 0x19e   : > { %2918 = vmatpush3.msra.mxu1 %v1501_v38  ;;  %2866 = vmatpush3.msra.mxu0 %v1531_v62 }
 0x19f   : > { %2839 = vmatmul.mubr.f32.gmra.mxu1 %v1279_v50  ;;  %2919 = vmatprep.subr.mxu1 %v1500_v39 }
 0x1a0   : > { %2841 = vmatprep.mubr.f32.mxu1 %v1280_v9  ;;  %2920 = vmatpush3.msra.mxu1 %v1500_v39 }
 0x1a1   : > { %2921 = vmatprep.subr.mxu1 %v1499_v40  ;;  %2867 = vmatprep.subr.mxu0 %v1530_v44 }
 0x1a2   : > { %2922 = vmatpush3.msra.mxu1 %v1499_v40  ;;  %2868 = vmatpush3.msra.mxu0 %v1530_v44 }
 0x1a3   : > { %2842 = vmatmul.mubr.f32.gmra.mxu1 %v1281_v13  ;;  %2923 = vmatprep.subr.mxu1 %v1498_v55 }
 0x1a4   : > { %2844 = vmatprep.mubr.f32.mxu1 %v1282_v14  ;;  %2924 = vmatpush3.msra.mxu1 %v1498_v55 }
 0x1a5   : > { %2925 = vmatprep.subr.mxu1 %v1497_v48  ;;  %2869 = vmatprep.subr.mxu0 %v1529_v63 }
 0x1a6   : > { %2926 = vmatpush3.msra.mxu1 %v1497_v48  ;;  %2870 = vmatpush3.msra.mxu0 %v1529_v63 }
 0x1a7   : > { %2845 = vmatmul.mubr.f32.gmra.mxu1 %v1283_v16  ;;  %2927 = vmatprep.subr.mxu1 %v1496_v60 }
 0x1a8   : > { %2847 = vmatprep.mubr.f32.mxu1 %v1284_v18  ;;  %2928 = vmatpush3.msra.mxu1 %v1496_v60 }
 0x1a9   : > { %2929 = vmatprep.subr.mxu1 %v1495_v56  ;;  %2871 = vmatprep.subr.mxu0 %v1528_v46 }
 0x1aa   : > { %2930 = vmatpush3.msra.mxu1 %v1495_v56  ;;  %2872 = vmatpush3.msra.mxu0 %v1528_v46 }
 0x1ab   : > { %2848 = vmatmul.mubr.f32.gmra.mxu1 %v1285_v52  ;;  %2931 = vmatprep.subr.mxu1 %v1494_v51 }
 0x1ac   : > { %2850 = vmatprep.mubr.f32.mxu1 %v1286_v24  ;;  %2932 = vmatpush3.msra.mxu1 %v1494_v51 }
 0x1ad   : > { %2933 = vmatprep.subr.mxu1 %v1493_v1  ;;  %2873 = vmatprep.subr.mxu0 %v1527_v58 }
 0x1ae   : > { %2934 = vmatpush3.msra.mxu1 %v1493_v1  ;;  %2874 = vmatpush3.msra.mxu0 %v1527_v58 }
 0x1af   : > { %2851 = vmatmul.mubr.f32.gmra.mxu1 %v1287_v26  ;;  %2935 = vmatprep.subr.mxu1 %v1492_v54 }
 0x1b0   : > { %2853 = vmatprep.mubr.f32.mxu1 %v1288_v28  ;;  %2936 = vmatpush3.msra.mxu1 %v1492_v54 }
 0x1b1   : > { %2937 = vmatprep.subr.mxu1 %v1491_v2  ;;  %2875 = vmatprep.subr.mxu0 %v1526_v3 }
 0x1b2   : > { %2938 = vmatpush3.msra.mxu1 %v1491_v2  ;;  %2876 = vmatpush3.msra.mxu0 %v1526_v3 }
 0x1b3   : > { %2854 = vmatmul.mubr.f32.gmra.mxu1 %v1289_v33  ;;  %2939 = vmatprep.subr.mxu1 %v1490_v47 }
 0x1b4   : > { %2856 = vmatprep.mubr.f32.mxu1 %v1290_v34  ;;  %2940 = vmatpush3.msra.mxu1 %v1490_v47  ;;  %v1856_v47 = vld [vmem:[#allocation9 + $0x170] sm:$0xff] }
 0x1b5   : > { %2877 = vmatprep.subr.mxu0 %v1525_v57  ;;  %2941 = vmatprep.subr.mxu1 %v1489_v4 }
 0x1b6   : > { %2878 = vmatpush3.msra.mxu0 %v1525_v57  ;;  %2942 = vmatpush3.msra.mxu1 %v1489_v4 }
 0x1b7   : > { %2857 = vmatmul.mubr.f32.gmra.mxu1 %v1291_v53  ;;  %2879 = vmatprep.subr.mxu0 %v1524_v5 }
 0x1b8   : > { %2943 = vmatprep.subr.mxu1 %v1488_v61  ;;  %2880 = vmatpush3.msra.mxu0 %v1524_v5 }
 0x1b9   : > { %2944 = vmatpush3.msra.mxu1 %v1488_v61  ;;  %2881 = vmatprep.subr.mxu0 %v1523_v6  ;;  %v3680_v61 = vld [vmem:[#allocation9 + $0x168] sm:$0xff] }
 0x1ba   : > { %2945 = vmatprep.subr.mxu1 %v1487_v7  ;;  %2882 = vmatpush3.msra.mxu0 %v1523_v6 }
 0x1bb   : > { %2946 = vmatpush3.msra.mxu1 %v1487_v7  ;;  %2883 = vmatprep.subr.mxu0 %v1522_v8 }
 0x1bc   : > { %3027 = vmatprep.subr.mxu1 %v3659_v49  ;;  %2884 = vmatpush3.msra.mxu0 %v1522_v8 }
 0x1bd   : > { %2885 = vmatprep.subr.mxu0 %v1521_v0 }
 0x1be   : > { %2886 = vmatpush3.msra.mxu0 %v1521_v0 }
 0x1bf   : > { %2887 = vmatprep.subr.mxu0 %v1520_v23 }
 0x1c0   : > { %2888 = vmatpush3.msra.mxu0 %v1520_v23  ;;  %v3682_v23 = vld [vmem:[#allocation9 + $0x160] sm:$0xff] }
 0x1c1   : > { %2889 = vmatprep.subr.mxu0 %v1519_v10 }
 0x1c2   : > { %2890 = vmatpush3.msra.mxu0 %v1519_v10 }
 0x1c3   : > { %2971 = vmatprep.subr.mxu0 %v3659_v49 }
 0x231   : > { %v2781_v12 = vpop.f32.mrf.mxu0 }
 0x233   : > { %v1197_v13 = vpop.f32.mrf.mxu0 }
 0x235   : > { %v2784_v18 = vpop.f32.mrf.mxu0 }
 0x237   : > { %v1207_v24 = vpop.f32.mrf.mxu0 }
 0x239   : > { %v2725_v11 = vpop.f32.mrf.mxu1  ;;  %v2787_v33 = vpop.f32.mrf.mxu0 }
 0x23a   : > { %v1203_v60 = vadd.f32 %v2781_v12, %v2725_v11 }
 0x23b   : > { %v1052_v50 = vpop.f32.mrf.mxu1  ;;  %v1217_v37 = vpop.f32.mrf.mxu0 }
 0x23c   : > { %v1198_v44 = vadd.f32 %v1197_v13, %v1052_v50 }
 0x23d   : > { %v2790_v40 = vpop.f32.mrf.mxu0 }
 0x23e   : > { %v2728_v9 = vpop.f32.mrf.mxu1 }
 0x23f   : > { %v1227_v43 = vpop.f32.mrf.mxu0  ;;  %v1213_v1 = vadd.f32 %v2784_v18, %v2728_v9 }
 0x240   : > { %v1062_v14 = vpop.f32.mrf.mxu1 }
 0x241   : > { %v1208_v2 = vadd.f32 %v1207_v24, %v1062_v14 }
 0x242   : > { %v2731_v16 = vpop.f32.mrf.mxu1  ;;  %v2793_v62 = vpop.f32.mrf.mxu0 }
 0x243   : > { %v1223_v4 = vadd.f32 %v2787_v33, %v2731_v16  ;;  %v3687_v16 = vld [vmem:[#allocation9 + $0x158] sm:$0xff] }
 0x244   : > { %v1072_v52 = vpop.f32.mrf.mxu1  ;;  %v1237_v54 = vpop.f32.mrf.mxu0 }
 0x245   : > { %v1218_v8 = vadd.f32 %v1217_v37, %v1072_v52 }
 0x246   : > { %v2796_v6 = vpop.f32.mrf.mxu0 }
 0x247   : > { %v2734_v26 = vpop.f32.mrf.mxu1 }
 0x248   : > { %v1233_v11 = vadd.f32 %v2790_v40, %v2734_v26  ;;  %v1247_v50 = vpop.f32.mrf.mxu0  ;;  %v3690_v26 = vld [vmem:[#allocation9 + $0x150] sm:$0xff] }
 0x249   : > { %v1082_v28 = vpop.f32.mrf.mxu1 }
 0x24a   : > { %v1228_v18 = vadd.f32 %v1227_v43, %v1082_v28  ;;  %v2799_v40 = vpop.f32.mrf.mxu0 }
 0x24b   : > { %v3663_v34 = vpop.f32.mrf.mxu1 }
 0x24c   : > { %v1243_v33 = vadd.f32 %v2793_v62, %v3663_v34 }
 0x24d   : > { %v3665_v53 = vpop.f32.mrf.mxu1 }
 0x24f   : > { %v3667_v38 = vpop.f32.mrf.mxu1 }
 0x251   : > { %v3669_v39 = vpop.f32.mrf.mxu1 }
 0x253   : > { %v3671_v45 = vpop.f32.mrf.mxu1 }
 0x255   : > { %v3673_v55 = vpop.f32.mrf.mxu1 }
 0x257   : > { %v3675_v48 = vpop.f32.mrf.mxu1 }
 0x259   : > { %v3677_v59 = vpop.f32.mrf.mxu1 }
 0x25b   : > { %v2837_v56 = vpop.f32.mrf.mxu1 }
 0x25c   : > { %v1455_v51 = vadd.f32 %v2837_v56, %v1203_v60  ;;  %v1238_v60 = vadd.f32 %v1237_v54, %v3665_v53 }
 0x25d   : > { %v1375_v63 = vpop.f32.mrf.mxu1 }
 0x25e   : > { %1471 = vst [vmem:[#allocation2 + $0x9] sm:$0xff] %v1455_v51  ;;  %v1454_v46 = vadd.f32 %v1375_v63, %v1198_v44  ;;  %v3698_v44 = vld [vmem:[#allocation9 + $0x148] sm:$0xff]  ;;  %v1257_v63 = vpop.f32.mrf.mxu0 }
 0x25f   : > { %v2840_v58 = vpop.f32.mrf.mxu1 }
 0x260   : > { %1470 = vst [vmem:[#allocation2 + $0x1] sm:$0xff] %v1454_v46  ;;  %v1457_v3 = vadd.f32 %v2840_v58, %v1213_v1  ;;  %2947 = vmatprep.mubr.f32.mxu1 %v1454_v46  ;;  %v3702_v1 = vld [vmem:[#allocation9 + $0x140] sm:$0xff]  ;;  %v1248_v46 = vadd.f32 %v1247_v50, %v3669_v39 }
 0x261   : > { %v1385_v57 = vpop.f32.mrf.mxu1  ;;  %2948 = vmatmul.mubr.f32.vlgmr.msra.gmra.mxu1 %v1455_v51  ;;  %v1253_v51 = vadd.f32 %v2796_v6, %v3667_v38 }
 0x262   : > { %1473 = vst [vmem:[#allocation2 + $0x21] sm:$0xff] %v1457_v3  ;;  %v1456_v5 = vadd.f32 %v1385_v57, %v1208_v2  ;;  %3043 = vmatpush3.msra.mxu1 %v3659_v49  ;;  %v1263_v2 = vadd.f32 %v2799_v40, %v3671_v45  ;;  %v1849_v57 = vld [vmem:[#allocation9 + $0x138] sm:$0xff] }
 0x263   : > { %v2843_v7 = vpop.f32.mrf.mxu1  ;;  %3028 = vmatprep.subr.mxu1 %v1856_v47 }
 0x264   : > { %1472 = vst [vmem:[#allocation2 + $0x19] sm:$0xff] %v1456_v5  ;;  %v1459_v0 = vadd.f32 %v2843_v7, %v1223_v4  ;;  %2950 = vmatprep.mubr.f32.mxu1 %v1456_v5  ;;  %3044 = vmatpush3.msra.mxu1 %v1856_v47  ;;  %v1258_v5 = vadd.f32 %v1257_v63, %v3673_v55 }
 0x265   : > { %v1395_v10 = vpop.f32.mrf.mxu1  ;;  %2951 = vmatmul.mubr.f32.gmra.mxu1 %v1457_v3  ;;  %3029 = vmatprep.subr.mxu1 %v3680_v61 }
 0x266   : > { %1475 = vst [vmem:[#allocation2 + $0x39] sm:$0xff] %v1459_v0  ;;  %v1458_v12 = vadd.f32 %v1395_v10, %v1218_v8  ;;  %3045 = vmatpush3.msra.mxu1 %v3680_v61 }
 0x267   : > { %v2846_v9 = vpop.f32.mrf.mxu1  ;;  %3030 = vmatprep.subr.mxu1 %v3682_v23  ;;  %v1503_v13 = vld [vmem:[#allocation2] sm:$0xff]  ;;  %v1504_v14 = vld [vmem:[#allocation2 + $0x8] sm:$0xff] }
 0x268   : > { %1474 = vst [vmem:[#allocation2 + $0x31] sm:$0xff] %v1458_v12  ;;  %v1461_v52 = vadd.f32 %v2846_v9, %v1233_v11  ;;  %2891 = vmatprep.mubr.f32.mxu0 %v1503_v13  ;;  %2953 = vmatprep.mubr.f32.mxu1 %v1458_v12  ;;  %v1846_v13 = vld [vmem:[#allocation9 + $0x120] sm:$0xff] }
 0x269   : > { %3046 = vmatpush3.msra.mxu1 %v3682_v23  ;;  %v1405_v24 = vpop.f32.mrf.mxu1  ;;  %2892 = vmatmul.mubr.f32.vlgmr.msra.gmra.mxu0 %v1504_v14 }
 0x26a   : > { %1477 = vst [vmem:[#allocation2 + $0x51] sm:$0xff] %v1461_v52  ;;  %v1460_v37 = vadd.f32 %v1405_v24, %v1228_v18  ;;  %2954 = vmatmul.mubr.f32.gmra.mxu1 %v1459_v0  ;;  %3031 = vmatprep.subr.mxu1 %v3687_v16  ;;  %v1844_v18 = vld [vmem:[#allocation9 + $0x110] sm:$0xff] }
 0x26b   : > { %2972 = vmatpush3.msra.mxu0 %v3659_v49  ;;  %3047 = vmatpush3.msra.mxu1 %v3687_v16  ;;  %v2849_v28 = vpop.f32.mrf.mxu1  ;;  %v1505_v43 = vld [vmem:[#allocation2 + $0x18] sm:$0xff]  ;;  %v1506_v34 = vld [vmem:[#allocation2 + $0x20] sm:$0xff] }
 0x26c   : > { %1476 = vst [vmem:[#allocation2 + $0x49] sm:$0xff] %v1460_v37  ;;  %v1463_v56 = vadd.f32 %v2849_v28, %v1243_v33  ;;  %2973 = vmatprep.subr.mxu0 %v1856_v47  ;;  %3032 = vmatprep.subr.mxu1 %v3690_v26  ;;  %v1842_v33 = vld [vmem:[#allocation9 + $0x100] sm:$0xff] }
 0x26d   : > { %2894 = vmatprep.mubr.f32.mxu0 %v1505_v43  ;;  %2956 = vmatprep.mubr.f32.mxu1 %v1460_v37  ;;  %v1415_v62 = vpop.f32.mrf.mxu1 }
 0x26e   : > { %1479 = vst [vmem:[#allocation2 + $0x69] sm:$0xff] %v1463_v56  ;;  %2974 = vmatpush3.msra.mxu0 %v1856_v47  ;;  %3048 = vmatpush3.msra.mxu1 %v3690_v26  ;;  %v1462_v49 = vadd.f32 %v1415_v62, %v1238_v60  ;;  %v2802_v47 = vpop.f32.mrf.mxu0 }
 0x26f   : > { %2895 = vmatmul.mubr.f32.gmra.mxu0 %v1506_v34  ;;  %2957 = vmatmul.mubr.f32.gmra.mxu1 %v1461_v52  ;;  %v2852_v53 = vpop.f32.mrf.mxu1  ;;  %v1507_v38 = vld [vmem:[#allocation2 + $0x30] sm:$0xff]  ;;  %v1508_v3 = vld [vmem:[#allocation2 + $0x38] sm:$0xff]  ;;  %v1273_v7 = vadd.f32 %v2802_v47, %v3675_v48  ;;  %v1847_v48 = vld [vmem:[#allocation9 + $0x128] sm:$0xff] }
 0x270   : > { %1478 = vst [vmem:[#allocation2 + $0x61] sm:$0xff] %v1462_v49  ;;  %2975 = vmatprep.subr.mxu0 %v3680_v61  ;;  %3033 = vmatprep.subr.mxu1 %v3698_v44  ;;  %v1465_v54 = vadd.f32 %v2852_v53, %v1253_v51  ;;  %v1267_v10 = vpop.f32.mrf.mxu0  ;;  %v1827_v53 = vld [vmem:[#allocation2 + $0x1a] sm:$0xff] }
 0x271   : > { %2976 = vmatpush3.msra.mxu0 %v3680_v61  ;;  %3049 = vmatpush3.msra.mxu1 %v3698_v44  ;;  %v1425_v58 = vpop.f32.mrf.mxu1  ;;  %v1848_v61 = vld [vmem:[#allocation9 + $0x130] sm:$0xff] }
 0x272   : > { %1481 = vst [vmem:[#allocation2 + $0x81] sm:$0xff] %v1465_v54  ;;  %2977 = vmatprep.subr.mxu0 %v3682_v23  ;;  %3034 = vmatprep.subr.mxu1 %v3702_v1  ;;  %v1464_v39 = vadd.f32 %v1425_v58, %v1248_v46  ;;  %v1828_v46 = vld [vmem:[#allocation2 + $0x22] sm:$0xff]  ;;  %v1830_v58 = vld [vmem:[#allocation2 + $0x3a] sm:$0xff] }
 0x273   : > { %2897 = vmatprep.mubr.f32.mxu0 %v1507_v38  ;;  %2959 = vmatprep.mubr.f32.mxu1 %v1462_v49  ;;  %v2855_v4 = vpop.f32.mrf.mxu1  ;;  %v1509_v8 = vld [vmem:[#allocation2 + $0x48] sm:$0xff]  ;;  %v1510_v11 = vld [vmem:[#allocation2 + $0x50] sm:$0xff] }
 0x274   : > { %2978 = vmatpush3.msra.mxu0 %v3682_v23  ;;  %3050 = vmatpush3.msra.mxu1 %v3702_v1  ;;  %1480 = vst [vmem:[#allocation2 + $0x79] sm:$0xff] %v1464_v39  ;;  %v1467_v45 = vadd.f32 %v2855_v4, %v1263_v2  ;;  %v1268_v23 = vadd.f32 %v1267_v10, %v3677_v59  ;;  %v1826_v49 = vld [vmem:[#allocation2 + $0xa] sm:$0xff]  ;;  %v1829_v38 = vld [vmem:[#allocation2 + $0x32] sm:$0xff] }
 0x275   : > { %2898 = vmatmul.mubr.f32.gmra.mxu0 %v1508_v3  ;;  %2960 = vmatmul.mubr.f32.gmra.mxu1 %v1463_v56  ;;  %v1435_v6 = vpop.f32.mrf.mxu1  ;;  %v1834_v43 = vld [vmem:[#allocation2 + $0x6a] sm:$0xff] }
 0x276   : > { %2979 = vmatprep.subr.mxu0 %v3687_v16  ;;  %3035 = vmatprep.subr.mxu1 %v1849_v57  ;;  %1483 = vst [vmem:[#allocation2 + $0x99] sm:$0xff] %v1467_v45  ;;  %v1466_v0 = vadd.f32 %v1435_v6, %v1258_v5  ;;  %v1831_v2 = vld [vmem:[#allocation2 + $0x4a] sm:$0xff] }
 0x277   : > { %2980 = vmatpush3.msra.mxu0 %v3687_v16  ;;  %3051 = vmatpush3.msra.mxu1 %v1849_v57  ;;  %v2858_v55 = vpop.f32.mrf.mxu1  ;;  %v1511_v59 = vld [vmem:[#allocation2 + $0x60] sm:$0xff]  ;;  %v1512_v14 = vld [vmem:[#allocation2 + $0x68] sm:$0xff]  ;;  %v1845_v16 = vld [vmem:[#allocation9 + $0x118] sm:$0xff] }
 0x278   : > { %2981 = vmatprep.subr.mxu0 %v3690_v26  ;;  %3036 = vmatprep.subr.mxu1 %v1848_v61  ;;  %1482 = vst [vmem:[#allocation2 + $0x91] sm:$0xff] %v1466_v0  ;;  %v1469_v12 = vadd.f32 %v2858_v55, %v1273_v7  ;;  %v1833_v40 = vld [vmem:[#allocation2 + $0x62] sm:$0xff] }
 0x279   : > { %2900 = vmatprep.mubr.f32.mxu0 %v1509_v8  ;;  %2962 = vmatprep.mubr.f32.mxu1 %v1464_v39  ;;  %v1445_v50 = vpop.f32.mrf.mxu1  ;;  %v1836_v62 = vld [vmem:[#allocation2 + $0x82] sm:$0xff]  ;;  %v1832_v39 = vld [vmem:[#allocation2 + $0x52] sm:$0xff] }
 0x27a   : > { %2982 = vmatpush3.msra.mxu0 %v3690_v26  ;;  %3052 = vmatpush3.msra.mxu1 %v1848_v61  ;;  %1485 = vst [vmem:[#allocation2 + $0xb1] sm:$0xff] %v1469_v12  ;;  %v1468_v9 = vadd.f32 %v1445_v50, %v1268_v23  ;;  %v1843_v26 = vld [vmem:[#allocation9 + $0x108] sm:$0xff] }
 0x27b   : > { %2901 = vmatmul.mubr.f32.gmra.mxu0 %v1510_v11  ;;  %2963 = vmatmul.mubr.f32.gmra.mxu1 %v1465_v54  ;;  %v1513_v52 = vld [vmem:[#allocation2 + $0x78] sm:$0xff]  ;;  %v1514_v24 = vld [vmem:[#allocation2 + $0x80] sm:$0xff] }
 0x27c   : > { %2983 = vmatprep.subr.mxu0 %v3698_v44  ;;  %3037 = vmatprep.subr.mxu1 %v1847_v48  ;;  %1484 = vst [vmem:[#allocation2 + $0xa9] sm:$0xff] %v1468_v9  ;;  %v1835_v56 = vld [vmem:[#allocation2 + $0x7a] sm:$0xff] }
 0x27d   : > { %2984 = vmatpush3.msra.mxu0 %v3698_v44  ;;  %3053 = vmatpush3.msra.mxu1 %v1847_v48  ;;  %v1825_v44 = vld [vmem:[#allocation2 + $0x2] sm:$0xff]  ;;  %v1838_v63 = vld [vmem:[#allocation2 + $0x9a] sm:$0xff] }
 0x27e   : > { %2985 = vmatprep.subr.mxu0 %v3702_v1  ;;  %3038 = vmatprep.subr.mxu1 %v1846_v13 }
 0x27f   : > { %2903 = vmatprep.mubr.f32.mxu0 %v1511_v59  ;;  %2965 = vmatprep.mubr.f32.mxu1 %v1466_v0  ;;  %v1515_v37 = vld [vmem:[#allocation2 + $0x90] sm:$0xff]  ;;  %v1516_v28 = vld [vmem:[#allocation2 + $0x98] sm:$0xff] }
 0x280   : > { %2986 = vmatpush3.msra.mxu0 %v3702_v1  ;;  %3054 = vmatpush3.msra.mxu1 %v1846_v13  ;;  %v1837_v51 = vld [vmem:[#allocation2 + $0x92] sm:$0xff] }
 0x281   : > { %2904 = vmatmul.mubr.f32.gmra.mxu0 %v1512_v14  ;;  %2966 = vmatmul.mubr.f32.gmra.mxu1 %v1467_v45  ;;  %v1840_v54 = vld [vmem:[#allocation2 + $0xb2] sm:$0xff] }
 0x282   : > { %2987 = vmatprep.subr.mxu0 %v1849_v57  ;;  %3039 = vmatprep.subr.mxu1 %v1845_v16 }
 0x283   : > { %2988 = vmatpush3.msra.mxu0 %v1849_v57  ;;  %3055 = vmatpush3.msra.mxu1 %v1845_v16  ;;  %v1517_v60 = vld [vmem:[#allocation2 + $0xa8] sm:$0xff]  ;;  %v1518_v34 = vld [vmem:[#allocation2 + $0xb0] sm:$0xff] }
 0x284   : > { %2989 = vmatprep.subr.mxu0 %v1848_v61  ;;  %3040 = vmatprep.subr.mxu1 %v1844_v18  ;;  %v1839_v1 = vld [vmem:[#allocation2 + $0xaa] sm:$0xff] }
 0x285   : > { %2906 = vmatprep.mubr.f32.mxu0 %v1513_v52  ;;  %2968 = vmatprep.mubr.f32.mxu1 %v1468_v9 }
 0x286   : > { %2990 = vmatpush3.msra.mxu0 %v1848_v61  ;;  %3056 = vmatpush3.msra.mxu1 %v1844_v18 }
 0x287   : > { %2907 = vmatmul.mubr.f32.gmra.mxu0 %v1514_v24  ;;  %2969 = vmatmul.mubr.f32.gmra.mxu1 %v1469_v12 }
 0x288   : > { %2991 = vmatprep.subr.mxu0 %v1847_v48  ;;  %3041 = vmatprep.subr.mxu1 %v1843_v26 }
 0x289   : > { %2992 = vmatpush3.msra.mxu0 %v1847_v48  ;;  %3057 = vmatpush3.msra.mxu1 %v1843_v26 }
 0x28a   : > { %3015 = vmatprep.mubr.f32.mxu1 %v1833_v40  ;;  %2993 = vmatprep.subr.mxu0 %v1846_v13 }
 0x28b   : > { %3042 = vmatprep.subr.mxu1 %v1842_v33  ;;  %2909 = vmatprep.mubr.f32.mxu0 %v1515_v37 }
 0x28c   : > { %2994 = vmatpush3.msra.mxu0 %v1846_v13  ;;  %3058 = vmatpush3.msra.mxu1 %v1842_v33 }
 0x28d   : > { %2910 = vmatmul.mubr.f32.gmra.mxu0 %v1516_v28  ;;  %2995 = vmatprep.subr.mxu0 %v1845_v16 }
 0x28e   : > { %3016 = vmatmul.mubr.f32.vlgmr.msra.gmra.mxu1 %v1834_v43  ;;  %2996 = vmatpush3.msra.mxu0 %v1845_v16  ;;  %v3738_v43 = vld [vmem:[%s3852_s5] ss:$0 sm:$0xff] }
 0x28f   : > { %3018 = vmatprep.mubr.f32.mxu1 %v1835_v56  ;;  %2997 = vmatprep.subr.mxu0 %v1844_v18 }
 0x290   : > { %2912 = vmatprep.mubr.f32.mxu0 %v1517_v60  ;;  %2998 = vmatpush3.msra.mxu0 %v1844_v18 }
 0x291   : > { %2913 = vmatmul.mubr.f32.gmra.mxu0 %v1518_v34  ;;  %2999 = vmatprep.subr.mxu0 %v1843_v26 }
 0x292   : > { %3019 = vmatmul.mubr.f32.gmra.mxu1 %v1836_v62  ;;  %3000 = vmatpush3.msra.mxu0 %v1843_v26 }
 0x293   : > { %3003 = vmatprep.mubr.f32.mxu0 %v1825_v44  ;;  %3021 = vmatprep.mubr.f32.mxu1 %v1837_v51 }
 0x294   : > { %3001 = vmatprep.subr.mxu0 %v1842_v33 }
 0x295   : > { %3002 = vmatpush3.msra.mxu0 %v1842_v33 }
 0x296   : > { %3004 = vmatmul.mubr.f32.vlgmr.msra.gmra.mxu0 %v1826_v49  ;;  %3022 = vmatmul.mubr.f32.gmra.mxu1 %v1838_v63 }
 0x297   : > { %3006 = vmatprep.mubr.f32.mxu0 %v1827_v53  ;;  %3024 = vmatprep.mubr.f32.mxu1 %v1839_v1 }
 0x29a   : > { %3007 = vmatmul.mubr.f32.gmra.mxu0 %v1828_v46  ;;  %3025 = vmatmul.mubr.f32.gmra.mxu1 %v1840_v54 }
 0x29b   : > { %3009 = vmatprep.mubr.f32.mxu0 %v1829_v38 }
 0x29e   : > { %3010 = vmatmul.mubr.f32.gmra.mxu0 %v1830_v58 }
 0x29f   : > { %3012 = vmatprep.mubr.f32.mxu0 %v1831_v2 }
 0x2a2   : > { %3013 = vmatmul.mubr.f32.gmra.mxu0 %v1832_v39 }
 0x321   : > { %v2949_v3 = vpop.f32.mrf.mxu1 }
 0x323   : > { %v1746_v47 = vpop.f32.mrf.mxu1 }
 0x325   : > { %v2952_v57 = vpop.f32.mrf.mxu1 }
 0x327   : > { %v1756_v4 = vpop.f32.mrf.mxu1 }
 0x329   : > { %v2893_v5 = vpop.f32.mrf.mxu0 }
 0x32a   : > { %v2955_v45 = vpop.f32.mrf.mxu1  ;;  %v1752_v2 = vadd.f32 %v2949_v3, %v2893_v5 }
 0x32b   : > { %v1601_v61 = vpop.f32.mrf.mxu0 }
 0x32c   : > { %v3725_v6 = vpop.f32.mrf.mxu1 }
 0x32f   : > { %v2896_v7 = vpop.f32.mrf.mxu0  ;;  %v3727_v8 = vpop.f32.mrf.mxu1 }
 0x331   : > { %v1611_v0 = vpop.f32.mrf.mxu0  ;;  %v3729_v10 = vpop.f32.mrf.mxu1 }
 0x335   : > { %v2899_v55 = vpop.f32.mrf.mxu0  ;;  %v2961_v23 = vpop.f32.mrf.mxu1 }
 0x337   : > { %v1621_v11 = vpop.f32.mrf.mxu0  ;;  %v1786_v12 = vpop.f32.mrf.mxu1 }
 0x33b   : > { %v3731_v48 = vpop.f32.mrf.mxu0  ;;  %v2964_v50 = vpop.f32.mrf.mxu1 }
 0x33d   : > { %v3733_v9 = vpop.f32.mrf.mxu0  ;;  %v1796_v13 = vpop.f32.mrf.mxu1 }
 0x341   : > { %v2905_v59 = vpop.f32.mrf.mxu0  ;;  %v2967_v14 = vpop.f32.mrf.mxu1 }
 0x342   : > { %v1792_v37 = vadd.f32 %v2961_v23, %v2905_v59 }
 0x343   : > { %v1641_v16 = vpop.f32.mrf.mxu0  ;;  %v1806_v18 = vpop.f32.mrf.mxu1 }
 0x344   : > { %v1787_v60 = vadd.f32 %v1786_v12, %v1641_v16  ;;  %v1747_v16 = vadd.f32 %v1746_v47, %v1601_v61 }
 0x347   : > { %v2908_v52 = vpop.f32.mrf.mxu0  ;;  %v2970_v24 = vpop.f32.mrf.mxu1 }
 0x348   : > { %v1802_v44 = vadd.f32 %v2964_v50, %v2908_v52  ;;  %v1762_v52 = vadd.f32 %v2952_v57, %v2896_v7 }
 0x349   : > { %v1651_v26 = vpop.f32.mrf.mxu0  ;;  %v1816_v33 = vpop.f32.mrf.mxu1 }
 0x34a   : > { %v1797_v1 = vadd.f32 %v1796_v13, %v1651_v26  ;;  %v1757_v26 = vadd.f32 %v1756_v4, %v1611_v0 }
 0x34d   : > { %v2911_v40 = vpop.f32.mrf.mxu0 }
 0x34e   : > { %v3017_v28 = vpop.f32.mrf.mxu1 }
 0x34f   : > { %v2012_v56 = vadd.f32 %v3017_v28, %v1792_v37  ;;  %v1661_v34 = vpop.f32.mrf.mxu0  ;;  %v1812_v37 = vadd.f32 %v2967_v14, %v2911_v40 }
 0x350   : > { %v1964_v62 = vpop.f32.mrf.mxu1  ;;  %v1807_v47 = vadd.f32 %v1806_v18, %v1661_v34 }
 0x351   : > { %v2035_v51 = vadd.f32 %v3738_v43, %v2012_v56  ;;  %v2011_v49 = vadd.f32 %v1964_v62, %v1787_v60  ;;  %v2914_v63 = vpop.f32.mrf.mxu0  ;;  %v1772_v60 = vadd.f32 %v2955_v45, %v2899_v55 }
 0x352   : > { %v3020_v53 = vpop.f32.mrf.mxu1 }
 0x353   : > { %v2051_v46 = vadd.f32 %v2035_v51, %v3569_v30  ;;  %v2034_v54 = vadd.f32 %v3738_v43, %v2011_v49  ;;  %v2014_v38 = vadd.f32 %v3020_v53, %v1802_v44  ;;  %v1671_v58 = vpop.f32.mrf.mxu0  ;;  %v1767_v44 = vadd.f32 %v3725_v6, %v1621_v11 }
 0x354   : > { %v1974_v39 = vpop.f32.mrf.mxu1 }
 0x355   : > { %v2067_v23 = vmax.f32 %v2051_v46, 0.0  ;;  %v2050_v12 = vadd.f32 %v2034_v54, %v3566_v29  ;;  %v2037_v50 = vadd.f32 %v3738_v43, %v2014_v38  ;;  %v2013_v59 = vadd.f32 %v1974_v39, %v1797_v1 }
 0x356   : > { %v3005_v28 = vpop.f32.mrf.mxu0  ;;  %v3023_v13 = vpop.f32.mrf.mxu1 }
 0x357   : > { %2083 = vst [vmem:[%s3747_s8 + $0x48] sm:$0xff] %v2067_v23  ;;  %v2066_v30 = vmax.f32 %v2050_v12, 0.0  ;;  %v2053_v3 = vadd.f32 %v2037_v50, %v3577_v32  ;;  %v2036_v5 = vadd.f32 %v3738_v43, %v2013_v59  ;;  %v2004_v29 = vadd.f32 %v3005_v28, %v1752_v2 }
 0x358   : > { %v2016_v57 = vadd.f32 %v3023_v13, %v1812_v37  ;;  %v1924_v61 = vpop.f32.mrf.mxu0  ;;  %v1984_v7 = vpop.f32.mrf.mxu1  ;;  %v1822_v32 = vadd.f32 %v2970_v24, %v2914_v63 }
 0x359   : > { %2082 = vst [vmem:[%s3747_s8 + $0x40] sm:$0xff] %v2066_v30  ;;  %v2069_v14 = vmax.f32 %v2053_v3, 0.0  ;;  %v2052_v40 = vadd.f32 %v2036_v5, %v3574_v31  ;;  %v2027_v56 = vadd.f32 %v3738_v43, %v2004_v29  ;;  %v2003_v62 = vadd.f32 %v1924_v61, %v1747_v16 }
 0x35a   : > { %v2039_v51 = vadd.f32 %v3738_v43, %v2016_v57  ;;  %v2015_v4 = vadd.f32 %v1984_v7, %v1807_v47  ;;  %v3008_v45 = vpop.f32.mrf.mxu0  ;;  %v3026_v0 = vpop.f32.mrf.mxu1  ;;  %v1817_v31 = vadd.f32 %v1816_v33, %v1671_v58 }
 0x35b   : > { %2085 = vst [vmem:[%s3747_s8 + $0x58] sm:$0xff] %v2069_v14  ;;  %v2068_v55 = vmax.f32 %v2052_v40, 0.0  ;;  %v2043_v18 = vadd.f32 %v2027_v56, %v3538_v17  ;;  %v2026_v34 = vadd.f32 %v3738_v43, %v2003_v62  ;;  %v2006_v49 = vadd.f32 %v3008_v45, %v1762_v52 }
 0x35c   : > { %v2055_v53 = vadd.f32 %v2039_v51, %v3585_v36  ;;  %v2038_v6 = vadd.f32 %v3738_v43, %v2015_v4  ;;  %v2018_v11 = vadd.f32 %v3026_v0, %v1822_v32  ;;  %v1934_v24 = vpop.f32.mrf.mxu0  ;;  %v1994_v63 = vpop.f32.mrf.mxu1 }
 0x35d   : > { %2084 = vst [vmem:[%s3747_s8 + $0x50] sm:$0xff] %v2068_v55  ;;  %v2059_v1 = vmax.f32 %v2043_v18, 0.0  ;;  %v2042_v46 = vadd.f32 %v2026_v34, %v3534_v15  ;;  %v2029_v54 = vadd.f32 %v3738_v43, %v2006_v49  ;;  %v2005_v17 = vadd.f32 %v1934_v24, %v1757_v26 }
 0x35e   : > { %v2071_v38 = vmax.f32 %v2055_v53, 0.0  ;;  %v2054_v33 = vadd.f32 %v2038_v6, %v3582_v35  ;;  %v2041_v58 = vadd.f32 %v3738_v43, %v2018_v11  ;;  %v2017_v36 = vadd.f32 %v1994_v63, %v1817_v31  ;;  %v3011_v2 = vpop.f32.mrf.mxu0 }
 0x35f   : > { %2075 = vst [vmem:[%s3747_s8 + $0x8] sm:$0xff] %v2059_v1  ;;  %v2058_v39 = vmax.f32 %v2042_v46, 0.0  ;;  %v2045_v23 = vadd.f32 %v2029_v54, %v3545_v20  ;;  %v2028_v12 = vadd.f32 %v3738_v43, %v2005_v17  ;;  %v2008_v50 = vadd.f32 %v3011_v2, %v1772_v60 }
 0x360   : > { %v1782_v15 = vadd.f32 %v3727_v8, %v3731_v48  ;;  %2087 = vst [vmem:[%s3747_s8 + $0x68] sm:$0xff] %v2071_v38  ;;  %v2070_v59 = vmax.f32 %v2054_v33, 0.0  ;;  %v2057_v35 = vadd.f32 %v2041_v58, %v3593_v42  ;;  %v2040_v16 = vadd.f32 %v3738_v43, %v2017_v36  ;;  %v1944_v52 = vpop.f32.mrf.mxu0 }
 0x361   : > { %2074 = vst [vmem:[%s3747_s8] sm:$0xff] %v2058_v39  ;;  %v2061_v37 = vmax.f32 %v2045_v23, 0.0  ;;  %v2044_v28 = vadd.f32 %v2028_v12, %v3542_v19  ;;  %v2031_v20 = vadd.f32 %v3738_v43, %v2008_v50  ;;  %v2007_v13 = vadd.f32 %v1944_v52, %v1767_v44 }
 0x362   : > { %v1777_v8 = vadd.f32 %v3729_v10, %v3733_v9  ;;  %2086 = vst [vmem:[%s3747_s8 + $0x60] sm:$0xff] %v2070_v59  ;;  %v2073_v48 = vmax.f32 %v2057_v35, 0.0  ;;  %v2056_v42 = vadd.f32 %v2040_v16, %v3590_v41  ;;  %v3014_v30 = vpop.f32.mrf.mxu0 }
 0x363   : > { %2077 = vst [vmem:[%s3747_s8 + $0x18] sm:$0xff] %v2061_v37  ;;  %v2060_v3 = vmax.f32 %v2044_v28, 0.0  ;;  %v2047_v5 = vadd.f32 %v2031_v20, %v3553_v22  ;;  %v2030_v19 = vadd.f32 %v3738_v43, %v2007_v13  ;;  %v2010_v29 = vadd.f32 %v3014_v30, %v1782_v15 }
 0x364   : > { %2089 = vst [vmem:[%s3747_s8 + $0x78] sm:$0xff] %v2073_v48  ;;  %v2072_v26 = vmax.f32 %v2056_v42, 0.0  ;;  %v1954_v10 = vpop.f32.mrf.mxu0 }
 0x365   : > { %2076 = vst [vmem:[%s3747_s8 + $0x10] sm:$0xff] %v2060_v3  ;;  %v2063_v9 = vmax.f32 %v2047_v5, 0.0  ;;  %v2046_v41 = vadd.f32 %v2030_v19, %v3550_v21  ;;  %v2033_v60 = vadd.f32 %v3738_v43, %v2010_v29  ;;  %v2009_v47 = vadd.f32 %v1954_v10, %v1777_v8 }
 0x366   : > { %2088 = vst [vmem:[%s3747_s8 + $0x70] sm:$0xff] %v2072_v26 }
 0x367   : > { %2079 = vst [vmem:[%s3747_s8 + $0x28] sm:$0xff] %v2063_v9  ;;  %v2062_v22 = vmax.f32 %v2046_v41, 0.0  ;;  %v2049_v57 = vadd.f32 %v2033_v60, %v3562_v27  ;;  %v2032_v61 = vadd.f32 %v3738_v43, %v2009_v47 }
 0x369   : > { %2078 = vst [vmem:[%s3747_s8 + $0x20] sm:$0xff] %v2062_v22  ;;  %v2065_v7 = vmax.f32 %v2049_v57, 0.0  ;;  %v2048_v14 = vadd.f32 %v2032_v61, %v3558_v25 }
 0x36b   : > { %2081 = vst [vmem:[%s3747_s8 + $0x38] sm:$0xff] %v2065_v7  ;;  %v2064_v21 = vmax.f32 %v2048_v14, 0.0 }
 0x36d   : > { %2080 = vst [vmem:[%s3747_s8 + $0x30] sm:$0xff] %v2064_v21 }
 0x36e   : > { %3260 = shalt.err (!%p3257_p10)
}
 0x36f   : > { %s3261_s27 = scalar_lea.hbm %s3800_s10, 2048  ;;  %s3265_s30 = scalar_lea.hbm %s3853_s6, 4096 }
 0x370   : > { %p3262_p6 = scmp.ne.s32.totalorder %s3800_s10, %s3261_s27  ;;  %p3266_p3 = scmp.lt.s32.totalorder %s3800_s10, %s3853_s6 }
 0x371   : > { %p3267_p11 = scmp.lt.s32.totalorder %s3265_s30, %s3261_s27 }
 0x372   : > { %p3263_p4 = pnand %p3262_p6, %p3874_p1 }
 0x373   : > { %p3268_p5 = por %p3267_p11, %p3266_p3 }
 0x374   : > { %p3264_p8 = pneg %p3263_p4 }
 0x376   : > { %p3269_p7 = pnand %p3268_p5, %p3264_p8 }
 0x378   : > { %3272 = shalt.err (!%p3269_p7)
}
 0x379   : > { %s3329_s16 = smov 128   ;;  %s3330_s17 = smov 8  }
 0x37a   : > { %3073 = dma.vmem_to_hbm [thread:$0]  (%p3874_p1), %s3802_s26, 2048, %s3800_s10, %s2091_s18, %s3329_s16, %s3329_s16, %s3330_s17  }
 0x37b PF: > { %s2120_s25 = sand.u32 1, %s3307_s21   ;;  %p3875_p12 = scmp.ne.s32.totalorder %s3861_s28, 0 }
 0x37c   : > { %p3876_p9 = scmp.ge.s32.totalorder %s3319_s24, 2  ;;  %s2121_s15 = scalar_lea.sflag [#allocation5], %s2120_s25 }
 0x37e   : > { %p3090_p13 = pnand %p3876_p9, %p3875_p12 }
 0x380   : > { %p3091_p0 = pneg %p3090_p13 }
 0x382   : > { %3302 = dma.done.wait (%p3091_p0), %s2121_s15, 2048  }
 0x383   : > { %3304 = vsyncadd (%p3091_p0), %s2121_s15, 4294965248  ;;  %p21_p2 = scmp.ge.s32.totalorder %s3455_s9, 4   ;;  %s3877_s21 = smov %s3311_s22 }
 0x384   : > { %s3878_s22 = smov %s3315_s23  ;;  %s3879_s23 = smov %s3465_s11 }
 0x385   : > { %s3880_s24 = smov %s3455_s9  ;;  %23 = sbr.rel (!%p21_p2) target bundleno = 7 (0x7), region = 107 }
 0x38a   :  { %2126 = vsyncpa [#allocation4], 1 }
 0x38b   :  { %2128 = vsyncpa [#allocation4 + $0x1], 1 }
 0x38c   :  { %2129 = vsyncpa [#allocation7], 1 }
 0x38d   :  { %2130 = vsyncpa [#allocation10], 1 }
 0x38e   :  { %2131 = vsyncpa [#allocation5], 1 }
 0x38f   :  { %2133 = vsyncpa [#allocation5 + $0x1], 1 }

</bundles_post_ra>
